<compile_context>
chip_gen: v7x
topology: tpu7x:2x2x1
jax: 0.10.0
libtpu: 0.0.40
codegen_flags: <defaults>
</compile_context>

<pallas_src>
import functools

import jax
import jax.numpy as jnp
from jax import lax
from jax.experimental import pallas as pl
from jax.experimental.pallas import tpu as pltpu

EPS = 1e-5   # BatchNorm1d default eps
COUT = 64    # h_dim == z_dim == 64 in the Encoder spec


def _encoder_kernel(x1_ref, w1_ref, w2_ref, w3_ref, w4_ref,
                    gamma_ref, beta_ref, o_ref, pad_ref, *, n, l0):
    """Fused Encoder forward.

    x1_ref:       (N*L0, 3)        im2col of the Cin=1 input (3 conv taps / position)
    w1_ref:       (3, 64)          block-1 weights, row k = torch_w1[:, 0, k]
    w{2,3,4}_ref: (192, 64)        row k*64 + ci == torch_w[co, ci, k]
    gamma_ref/beta_ref: (4, 64)    BN affine params, one row per block
    o_ref:        (N*L0//16, 64)   channels-last output of block 4
    pad_ref:      (N, L0//2+2, 64) VMEM scratch: zero-padded activations, blocks 2..4
    """
    c = COUT
    gammas = gamma_ref[...]
    betas = beta_ref[...]

    def bn_relu_pool(y, blk):
        # Training-mode BatchNorm1d folded into one per-channel FMA.
        m = y.shape[0]
        inv_m = 1.0 / m
        s = jnp.sum(y, axis=0, keepdims=True)
        ss = jnp.sum(y * y, axis=0, keepdims=True)
        mean = s * inv_m
        var = ss * inv_m - mean * mean                 # biased var (PyTorch train mode)
        scale = gammas[blk:blk + 1, :] * lax.rsqrt(var + EPS)
        shift = betas[blk:blk + 1, :] - mean * scale
        y = jnp.maximum(y * scale + shift, 0.0)        # BN + ReLU in one FMA + max
        # MaxPool1d(2): adjacent L positions are adjacent rows; L is even at every
        # stage, so the (2j, 2j+1) pairs never straddle a batch boundary.
        return jnp.max(y.reshape(m // 2, 2, c), axis=1)

    # ---------- block 1 (Cin = 1): one tiny (M,3)x(3,64) dot, no K=1 matmul ----------
    y = jnp.dot(x1_ref[...], w1_ref[...], preferred_element_type=jnp.float32)
    act = bn_relu_pool(y, 0)                           # (N*L0/2, 64)
    l_cur = l0 // 2

    # ---------- blocks 2..4 (Cin = 64) ----------
    for blk, w_ref in ((1, w2_ref), (2, w3_ref), (3, w4_ref)):
        m = n * l_cur
        zero_edge = jnp.zeros((n, 1, c), jnp.float32)
        # Zero-pad along L inside the reused VMEM scratch (boundary rows re-zeroed
        # each block because the previous block wrote activations into them).
        pad_ref[:, 0:1, :] = zero_edge
        pad_ref[:, l_cur + 1:l_cur + 2, :] = zero_edge
        pad_ref[:, 1:l_cur + 1, :] = act.reshape(n, l_cur, c)
        # Conv1d(k=3) as 3 shifted matmuls on the MXU (kept as 3 K=64 dots rather than
        # one K=192 im2col dot so every op stays on the proven lowering path).
        acc = jnp.zeros((m, c), jnp.float32)
        for k in range(3):
            xs = pad_ref[:, k:k + l_cur, :].reshape(m, c)
            wk = w_ref[pl.ds(k * c, c), :]
            acc = acc + jnp.dot(xs, wk, preferred_element_type=jnp.float32)
        act = bn_relu_pool(acc, blk)
        l_cur //= 2

    o_ref[...] = act


@jax.jit
def encoder_forward(x_ncl, params):
    """x_ncl: (N, 1, L) -> (N, 64 * L // 16), matching Encoder.forward (train-mode BN)."""
    n, cin, l0 = x_ncl.shape
    assert cin == 1 and l0 % 16 == 0, (cin, l0)
    c = COUT
    l_out = l0 // 16

    x = x_ncl[:, 0, :].astype(jnp.float32)                        # (N, L)
    xpad = jnp.pad(x, ((0, 0), (1, 1)))
    # im2col for the Cin=1 first conv: the 3 taps per output position.
    x1 = jnp.stack([xpad[:, k:k + l0] for k in range(3)], axis=-1).reshape(n * l0, 3)

    def conv_w(w):  # (Cout, Cin, 3) -> (3*Cin, Cout); row = k*Cin + ci
        return jnp.transpose(w, (2, 1, 0)).reshape(-1, w.shape[0])

    w1 = conv_w(params[0][0])                                     # (3, 64)
    w2 = conv_w(params[1][0])                                     # (192, 64)
    w3 = conv_w(params[2][0])
    w4 = conv_w(params[3][0])
    gamma = jnp.stack([p[2] for p in params])                     # (4, 64)
    beta = jnp.stack([p[3] for p in params])                      # (4, 64)
    # NOTE: conv biases params[i][1] are intentionally unused: training-mode BN
    # subtracts the batch mean, so the per-channel constant bias cancels exactly.

    flops = 2 * n * l0 * 3 * c
    for i in range(1, 4):
        flops += 2 * (n * (l0 >> i)) * 3 * c * c
    bytes_accessed = 4 * (x1.size + w1.size + w2.size + w3.size + w4.size
                          + gamma.size + beta.size + n * l_out * c)

    kernel = functools.partial(_encoder_kernel, n=n, l0=l0)
    vmem = pl.BlockSpec(memory_space=pltpu.MemorySpace.VMEM)
    out = pl.pallas_call(
        kernel,
        out_shape=jax.ShapeDtypeStruct((n * l_out, c), jnp.float32),
        in_specs=[vmem] * 7,
        out_specs=vmem,
        scratch_shapes=[pltpu.VMEM((n, l0 // 2 + 2, c), jnp.float32)],
        cost_estimate=pl.CostEstimate(flops=flops, transcendentals=4 * c,
                                      bytes_accessed=bytes_accessed),
        compiler_params=pltpu.CompilerParams(vmem_limit_bytes=32 * 1024 * 1024),
    )(x1, w1, w2, w3, w4, gamma, beta)

    # Flatten exactly like PyTorch: (N, C, L_out).view(N, -1)
    out = out.reshape(n, l_out, c)
    return jnp.transpose(out, (0, 2, 1)).reshape(n, c * l_out)


def init_encoder_params(key, h_dim=64, z_dim=64, channel=1):
    """Deterministic synthetic parameters matching Encoder.__init__ shapes."""
    in_chs = [channel, h_dim, h_dim, h_dim]
    params = []
    for i, cin in enumerate(in_chs):
        kw, kb = jax.random.split(jax.random.fold_in(key, i))
        w = jax.random.normal(kw, (z_dim, cin, 3), jnp.float32) * 0.1
        b = jax.random.normal(kb, (z_dim,), jnp.float32) * 0.05   # kept only for the ref
        gamma = jnp.ones((z_dim,), jnp.float32)
        beta = jnp.zeros((z_dim,), jnp.float32)
        params.append((w, b, gamma, beta))
    return params


# ---- pure-JAX reference (includes the conv bias; proves it cancels under BN) ----
def _ref_block(x_ncl, w, b, gamma, beta):
    y = lax.conv_general_dilated(
        x_ncl, w, window_strides=(1,), padding=((1, 1),),
        dimension_numbers=("NCH", "OIH", "NCH"))
    y = y + b[None, :, None]
    mean = jnp.mean(y, axis=(0, 2), keepdims=True)
    var = jnp.mean((y - mean) ** 2, axis=(0, 2), keepdims=True)
    y = (y - mean) * lax.rsqrt(var + EPS)
    y = y * gamma[None, :, None] + beta[None, :, None]
    y = jnp.maximum(y, 0.0)
    nb, cc, ll = y.shape
    return jnp.max(y.reshape(nb, cc, ll // 2, 2), axis=-1)


def _ref_forward(x_ncl, params):
    net = x_ncl.astype(jnp.float32)
    for (w, b, g, beta) in params:
        net = _ref_block(net, w, b, g, beta)
    return net.reshape(net.shape[0], -1)


if __name__ == "__main__":
    key = jax.random.PRNGKey(0)
    kx, kp = jax.random.split(key)
    params = init_encoder_params(kp)

    for L in (16, 32):   # final lengths 1 and 2 (exercises the flatten ordering)
        x = jax.random.normal(jax.random.fold_in(kx, L), (2, 1, L), jnp.float32)
        out = jax.block_until_ready(encoder_forward(x, params))
        ref = _ref_forward(x, params)
        assert out.shape == (2, 64 * (L // 16)), out.shape
        err = float(jnp.max(jnp.abs(out - ref)))
        assert jnp.allclose(out, ref, atol=1e-3, rtol=1e-3), err

    print("KERNEL_OK")
</pallas_src>

<mosaic_0001>
module attributes {stable_mosaic.version = 11 : i64} {
  func.func @_encoder_kernel(%arg0: memref<32x3xf32, #tpu.memory_space<vmem>>, %arg1: memref<3x64xf32, #tpu.memory_space<vmem>>, %arg2: memref<192x64xf32, #tpu.memory_space<vmem>>, %arg3: memref<192x64xf32, #tpu.memory_space<vmem>>, %arg4: memref<192x64xf32, #tpu.memory_space<vmem>>, %arg5: memref<4x64xf32, #tpu.memory_space<vmem>>, %arg6: memref<4x64xf32, #tpu.memory_space<vmem>>, %arg7: memref<2x64xf32, #tpu.memory_space<vmem>>, %arg8: memref<2x10x64xf32, #tpu.memory_space<vmem>>) attributes {dimension_semantics = [], scalar_prefetch = 0 : i64, scratch_operands = 1 : i64, tpu.core_type = #tpu.core_type<tc>} {
    %c0 = arith.constant 0 : index
    %c0_0 = arith.constant 0 : index
    %0 = vector.load %arg5[%c0, %c0_0] : memref<4x64xf32, #tpu.memory_space<vmem>>, vector<4x64xf32>
    %c0_1 = arith.constant 0 : index
    %c0_2 = arith.constant 0 : index
    %1 = vector.load %arg6[%c0_1, %c0_2] : memref<4x64xf32, #tpu.memory_space<vmem>>, vector<4x64xf32>
    %c0_3 = arith.constant 0 : index
    %c0_4 = arith.constant 0 : index
    %2 = vector.load %arg0[%c0_3, %c0_4] : memref<32x3xf32, #tpu.memory_space<vmem>>, vector<32x3xf32>
    %c0_5 = arith.constant 0 : index
    %c0_6 = arith.constant 0 : index
    %3 = vector.load %arg1[%c0_5, %c0_6] : memref<3x64xf32, #tpu.memory_space<vmem>>, vector<3x64xf32>
    %cst = arith.constant dense<0.000000e+00> : vector<32x64xf32>
    %4 = tpu.matmul %2, %3, %cst {dimension_numbers = #tpu.dot_dimension_numbers<[1], [0], [0], [1], [0, 0, 1, 1], [], []>} : vector<32x3xf32>, vector<3x64xf32>, vector<32x64xf32> -> vector<32x64xf32>
    %cst_7 = arith.constant dense<0.000000e+00> : vector<64xf32>
    %5 = vector.multi_reduction <add>, %4, %cst_7 [0] : vector<32x64xf32> to vector<64xf32>
    %6 = vector.shape_cast %5 : vector<64xf32> to vector<1x64xf32>
    %7 = arith.mulf %4, %4 : vector<32x64xf32>
    %cst_8 = arith.constant dense<0.000000e+00> : vector<64xf32>
    %8 = vector.multi_reduction <add>, %7, %cst_8 [0] : vector<32x64xf32> to vector<64xf32>
    %9 = vector.shape_cast %8 : vector<64xf32> to vector<1x64xf32>
    %cst_9 = arith.constant 3.125000e-02 : f32
    %10 = vector.broadcast %cst_9 : f32 to vector<1x64xf32>
    %11 = arith.mulf %6, %10 : vector<1x64xf32>
    %cst_10 = arith.constant 3.125000e-02 : f32
    %12 = vector.broadcast %cst_10 : f32 to vector<1x64xf32>
    %13 = arith.mulf %9, %12 : vector<1x64xf32>
    %14 = arith.mulf %11, %11 : vector<1x64xf32>
    %15 = arith.subf %13, %14 : vector<1x64xf32>
    %16 = vector.extract_strided_slice %0 {offsets = [0, 0], sizes = [1, 64], strides = [1, 1]} : vector<4x64xf32> to vector<1x64xf32>
    %cst_11 = arith.constant 9.99999974E-6 : f32
    %17 = vector.broadcast %cst_11 : f32 to vector<1x64xf32>
    %18 = arith.addf %15, %17 : vector<1x64xf32>
    %19 = math.rsqrt %18 : vector<1x64xf32>
    %20 = arith.mulf %16, %19 : vector<1x64xf32>
    %21 = vector.extract_strided_slice %1 {offsets = [0, 0], sizes = [1, 64], strides = [1, 1]} : vector<4x64xf32> to vector<1x64xf32>
    %22 = arith.mulf %11, %20 : vector<1x64xf32>
    %23 = arith.subf %21, %22 : vector<1x64xf32>
    %24 = vector.broadcast %20 : vector<1x64xf32> to vector<32x64xf32>
    %25 = arith.mulf %4, %24 : vector<32x64xf32>
    %26 = vector.broadcast %23 : vector<1x64xf32> to vector<32x64xf32>
    %27 = arith.addf %25, %26 : vector<32x64xf32>
    %cst_12 = arith.constant 0.000000e+00 : f32
    %28 = vector.broadcast %cst_12 : f32 to vector<32x64xf32>
    %29 = arith.maximumf %27, %28 : vector<32x64xf32>
    %30 = vector.shape_cast %29 : vector<32x64xf32> to vector<16x2x64xf32>
    %cst_13 = arith.constant dense<0xFF800000> : vector<16x64xf32>
    %31 = vector.multi_reduction <maximumf>, %30, %cst_13 [1] : vector<16x2x64xf32> to vector<16x64xf32>
    %cst_14 = arith.constant 0.000000e+00 : f32
    %32 = vector.broadcast %cst_14 : f32 to vector<2x1x64xf32>
    %c0_15 = arith.constant 0 : index
    %c0_16 = arith.constant 0 : index
    %c0_17 = arith.constant 0 : index
    %33 = vector.load %arg8[%c0_15, %c0_16, %c0_17] : memref<2x10x64xf32, #tpu.memory_space<vmem>>, vector<2x1x64xf32>
    tpu.vector_store %arg8[%c0_15, %c0_16, %c0_17], %32 {strides = array<i32>} : memref<2x10x64xf32, #tpu.memory_space<vmem>>, vector<2x1x64xf32>,
    %c0_18 = arith.constant 0 : index
    %c9 = arith.constant 9 : index
    %c0_19 = arith.constant 0 : index
    %34 = vector.load %arg8[%c0_18, %c9, %c0_19] : memref<2x10x64xf32, #tpu.memory_space<vmem>>, vector<2x1x64xf32>
    tpu.vector_store %arg8[%c0_18, %c9, %c0_19], %32 {strides = array<i32>} : memref<2x10x64xf32, #tpu.memory_space<vmem>>, vector<2x1x64xf32>,
    %35 = vector.shape_cast %31 : vector<16x64xf32> to vector<2x8x64xf32>
    %c0_20 = arith.constant 0 : index
    %c1 = arith.constant 1 : index
    %c0_21 = arith.constant 0 : index
    %36 = vector.load %arg8[%c0_20, %c1, %c0_21] : memref<2x10x64xf32, #tpu.memory_space<vmem>>, vector<2x8x64xf32>
    tpu.vector_store %arg8[%c0_20, %c1, %c0_21], %35 {strides = array<i32>} : memref<2x10x64xf32, #tpu.memory_space<vmem>>, vector<2x8x64xf32>,
    %cst_22 = arith.constant 0.000000e+00 : f32
    %37 = vector.broadcast %cst_22 : f32 to vector<16x64xf32>
    %c0_23 = arith.constant 0 : index
    %c0_24 = arith.constant 0 : index
    %c0_25 = arith.constant 0 : index
    %38 = vector.load %arg8[%c0_23, %c0_24, %c0_25] : memref<2x10x64xf32, #tpu.memory_space<vmem>>, vector<2x8x64xf32>
    %39 = vector.shape_cast %38 : vector<2x8x64xf32> to vector<16x64xf32>
    %c0_26 = arith.constant 0 : index
    %c0_27 = arith.constant 0 : index
    %40 = vector.load %arg2[%c0_26, %c0_27] : memref<192x64xf32, #tpu.memory_space<vmem>>, vector<64x64xf32>
    %cst_28 = arith.constant dense<0.000000e+00> : vector<16x64xf32>
    %41 = tpu.matmul %39, %40, %cst_28 {dimension_numbers = #tpu.dot_dimension_numbers<[1], [0], [0], [1], [0, 0, 1, 1], [], []>} : vector<16x64xf32>, vector<64x64xf32>, vector<16x64xf32> -> vector<16x64xf32>
    %42 = arith.addf %37, %41 : vector<16x64xf32>
    %c0_29 = arith.constant 0 : index
    %c1_30 = arith.constant 1 : index
    %c0_31 = arith.constant 0 : index
    %43 = vector.load %arg8[%c0_29, %c1_30, %c0_31] : memref<2x10x64xf32, #tpu.memory_space<vmem>>, vector<2x8x64xf32>
    %44 = vector.shape_cast %43 : vector<2x8x64xf32> to vector<16x64xf32>
    %c64 = arith.constant 64 : index
    %c0_32 = arith.constant 0 : index
    %45 = vector.load %arg2[%c64, %c0_32] : memref<192x64xf32, #tpu.memory_space<vmem>>, vector<64x64xf32>
    %cst_33 = arith.constant dense<0.000000e+00> : vector<16x64xf32>
    %46 = tpu.matmul %44, %45, %cst_33 {dimension_numbers = #tpu.dot_dimension_numbers<[1], [0], [0], [1], [0, 0, 1, 1], [], []>} : vector<16x64xf32>, vector<64x64xf32>, vector<16x64xf32> -> vector<16x64xf32>
    %47 = arith.addf %42, %46 : vector<16x64xf32>
    %c0_34 = arith.constant 0 : index
    %c2 = arith.constant 2 : index
    %c0_35 = arith.constant 0 : index
    %48 = vector.load %arg8[%c0_34, %c2, %c0_35] : memref<2x10x64xf32, #tpu.memory_space<vmem>>, vector<2x8x64xf32>
    %49 = vector.shape_cast %48 : vector<2x8x64xf32> to vector<16x64xf32>
    %c128 = arith.constant 128 : index
    %c0_36 = arith.constant 0 : index
    %50 = vector.load %arg2[%c128, %c0_36] : memref<192x64xf32, #tpu.memory_space<vmem>>, vector<64x64xf32>
    %cst_37 = arith.constant dense<0.000000e+00> : vector<16x64xf32>
    %51 = tpu.matmul %49, %50, %cst_37 {dimension_numbers = #tpu.dot_dimension_numbers<[1], [0], [0], [1], [0, 0, 1, 1], [], []>} : vector<16x64xf32>, vector<64x64xf32>, vector<16x64xf32> -> vector<16x64xf32>
    %52 = arith.addf %47, %51 : vector<16x64xf32>
    %cst_38 = arith.constant dense<0.000000e+00> : vector<64xf32>
    %53 = vector.multi_reduction <add>, %52, %cst_38 [0] : vector<16x64xf32> to vector<64xf32>
    %54 = vector.shape_cast %53 : vector<64xf32> to vector<1x64xf32>
    %55 = arith.mulf %52, %52 : vector<16x64xf32>
    %cst_39 = arith.constant dense<0.000000e+00> : vector<64xf32>
    %56 = vector.multi_reduction <add>, %55, %cst_39 [0] : vector<16x64xf32> to vector<64xf32>
    %57 = vector.shape_cast %56 : vector<64xf32> to vector<1x64xf32>
    %cst_40 = arith.constant 6.250000e-02 : f32
    %58 = vector.broadcast %cst_40 : f32 to vector<1x64xf32>
    %59 = arith.mulf %54, %58 : vector<1x64xf32>
    %cst_41 = arith.constant 6.250000e-02 : f32
    %60 = vector.broadcast %cst_41 : f32 to vector<1x64xf32>
    %61 = arith.mulf %57, %60 : vector<1x64xf32>
    %62 = arith.mulf %59, %59 : vector<1x64xf32>
    %63 = arith.subf %61, %62 : vector<1x64xf32>
    %64 = vector.extract_strided_slice %0 {offsets = [1, 0], sizes = [1, 64], strides = [1, 1]} : vector<4x64xf32> to vector<1x64xf32>
    %cst_42 = arith.constant 9.99999974E-6 : f32
    %65 = vector.broadcast %cst_42 : f32 to vector<1x64xf32>
    %66 = arith.addf %63, %65 : vector<1x64xf32>
    %67 = math.rsqrt %66 : vector<1x64xf32>
    %68 = arith.mulf %64, %67 : vector<1x64xf32>
    %69 = vector.extract_strided_slice %1 {offsets = [1, 0], sizes = [1, 64], strides = [1, 1]} : vector<4x64xf32> to vector<1x64xf32>
    %70 = arith.mulf %59, %68 : vector<1x64xf32>
    %71 = arith.subf %69, %70 : vector<1x64xf32>
    %72 = vector.broadcast %68 : vector<1x64xf32> to vector<16x64xf32>
    %73 = arith.mulf %52, %72 : vector<16x64xf32>
    %74 = vector.broadcast %71 : vector<1x64xf32> to vector<16x64xf32>
    %75 = arith.addf %73, %74 : vector<16x64xf32>
    %cst_43 = arith.constant 0.000000e+00 : f32
    %76 = vector.broadcast %cst_43 : f32 to vector<16x64xf32>
    %77 = arith.maximumf %75, %76 : vector<16x64xf32>
    %78 = vector.shape_cast %77 : vector<16x64xf32> to vector<8x2x64xf32>
    %cst_44 = arith.constant dense<0xFF800000> : vector<8x64xf32>
    %79 = vector.multi_reduction <maximumf>, %78, %cst_44 [1] : vector<8x2x64xf32> to vector<8x64xf32>
    %cst_45 = arith.constant 0.000000e+00 : f32
    %80 = vector.broadcast %cst_45 : f32 to vector<2x1x64xf32>
    %c0_46 = arith.constant 0 : index
    %c0_47 = arith.constant 0 : index
    %c0_48 = arith.constant 0 : index
    %81 = vector.load %arg8[%c0_46, %c0_47, %c0_48] : memref<2x10x64xf32, #tpu.memory_space<vmem>>, vector<2x1x64xf32>
    tpu.vector_store %arg8[%c0_46, %c0_47, %c0_48], %80 {strides = array<i32>} : memref<2x10x64xf32, #tpu.memory_space<vmem>>, vector<2x1x64xf32>,
    %c0_49 = arith.constant 0 : index
    %c5 = arith.constant 5 : index
    %c0_50 = arith.constant 0 : index
    %82 = vector.load %arg8[%c0_49, %c5, %c0_50] : memref<2x10x64xf32, #tpu.memory_space<vmem>>, vector<2x1x64xf32>
    tpu.vector_store %arg8[%c0_49, %c5, %c0_50], %80 {strides = array<i32>} : memref<2x10x64xf32, #tpu.memory_space<vmem>>, vector<2x1x64xf32>,
    %83 = vector.shape_cast %79 : vector<8x64xf32> to vector<2x4x64xf32>
    %c0_51 = arith.constant 0 : index
    %c1_52 = arith.constant 1 : index
    %c0_53 = arith.constant 0 : index
    %84 = vector.load %arg8[%c0_51, %c1_52, %c0_53] : memref<2x10x64xf32, #tpu.memory_space<vmem>>, vector<2x4x64xf32>
    tpu.vector_store %arg8[%c0_51, %c1_52, %c0_53], %83 {strides = array<i32>} : memref<2x10x64xf32, #tpu.memory_space<vmem>>, vector<2x4x64xf32>,
    %cst_54 = arith.constant 0.000000e+00 : f32
    %85 = vector.broadcast %cst_54 : f32 to vector<8x64xf32>
    %c0_55 = arith.constant 0 : index
    %c0_56 = arith.constant 0 : index
    %c0_57 = arith.constant 0 : index
    %86 = vector.load %arg8[%c0_55, %c0_56, %c0_57] : memref<2x10x64xf32, #tpu.memory_space<vmem>>, vector<2x4x64xf32>
    %87 = vector.shape_cast %86 : vector<2x4x64xf32> to vector<8x64xf32>
    %c0_58 = arith.constant 0 : index
    %c0_59 = arith.constant 0 : index
    %88 = vector.load %arg3[%c0_58, %c0_59] : memref<192x64xf32, #tpu.memory_space<vmem>>, vector<64x64xf32>
    %cst_60 = arith.constant dense<0.000000e+00> : vector<8x64xf32>
    %89 = tpu.matmul %87, %88, %cst_60 {dimension_numbers = #tpu.dot_dimension_numbers<[1], [0], [0], [1], [0, 0, 1, 1], [], []>} : vector<8x64xf32>, vector<64x64xf32>, vector<8x64xf32> -> vector<8x64xf32>
    %90 = arith.addf %85, %89 : vector<8x64xf32>
    %c0_61 = arith.constant 0 : index
    %c1_62 = arith.constant 1 : index
    %c0_63 = arith.constant 0 : index
    %91 = vector.load %arg8[%c0_61, %c1_62, %c0_63] : memref<2x10x64xf32, #tpu.memory_space<vmem>>, vector<2x4x64xf32>
    %92 = vector.shape_cast %91 : vector<2x4x64xf32> to vector<8x64xf32>
    %c64_64 = arith.constant 64 : index
    %c0_65 = arith.constant 0 : index
    %93 = vector.load %arg3[%c64_64, %c0_65] : memref<192x64xf32, #tpu.memory_space<vmem>>, vector<64x64xf32>
    %cst_66 = arith.constant dense<0.000000e+00> : vector<8x64xf32>
    %94 = tpu.matmul %92, %93, %cst_66 {dimension_numbers = #tpu.dot_dimension_numbers<[1], [0], [0], [1], [0, 0, 1, 1], [], []>} : vector<8x64xf32>, vector<64x64xf32>, vector<8x64xf32> -> vector<8x64xf32>
    %95 = arith.addf %90, %94 : vector<8x64xf32>
    %c0_67 = arith.constant 0 : index
    %c2_68 = arith.constant 2 : index
    %c0_69 = arith.constant 0 : index
    %96 = vector.load %arg8[%c0_67, %c2_68, %c0_69] : memref<2x10x64xf32, #tpu.memory_space<vmem>>, vector<2x4x64xf32>
    %97 = vector.shape_cast %96 : vector<2x4x64xf32> to vector<8x64xf32>
    %c128_70 = arith.constant 128 : index
    %c0_71 = arith.constant 0 : index
    %98 = vector.load %arg3[%c128_70, %c0_71] : memref<192x64xf32, #tpu.memory_space<vmem>>, vector<64x64xf32>
    %cst_72 = arith.constant dense<0.000000e+00> : vector<8x64xf32>
    %99 = tpu.matmul %97, %98, %cst_72 {dimension_numbers = #tpu.dot_dimension_numbers<[1], [0], [0], [1], [0, 0, 1, 1], [], []>} : vector<8x64xf32>, vector<64x64xf32>, vector<8x64xf32> -> vector<8x64xf32>
    %100 = arith.addf %95, %99 : vector<8x64xf32>
    %cst_73 = arith.constant dense<0.000000e+00> : vector<64xf32>
    %101 = vector.multi_reduction <add>, %100, %cst_73 [0] : vector<8x64xf32> to vector<64xf32>
    %102 = vector.shape_cast %101 : vector<64xf32> to vector<1x64xf32>
    %103 = arith.mulf %100, %100 : vector<8x64xf32>
    %cst_74 = arith.constant dense<0.000000e+00> : vector<64xf32>
    %104 = vector.multi_reduction <add>, %103, %cst_74 [0] : vector<8x64xf32> to vector<64xf32>
    %105 = vector.shape_cast %104 : vector<64xf32> to vector<1x64xf32>
    %cst_75 = arith.constant 1.250000e-01 : f32
    %106 = vector.broadcast %cst_75 : f32 to vector<1x64xf32>
    %107 = arith.mulf %102, %106 : vector<1x64xf32>
    %cst_76 = arith.constant 1.250000e-01 : f32
    %108 = vector.broadcast %cst_76 : f32 to vector<1x64xf32>
    %109 = arith.mulf %105, %108 : vector<1x64xf32>
    %110 = arith.mulf %107, %107 : vector<1x64xf32>
    %111 = arith.subf %109, %110 : vector<1x64xf32>
    %112 = vector.extract_strided_slice %0 {offsets = [2, 0], sizes = [1, 64], strides = [1, 1]} : vector<4x64xf32> to vector<1x64xf32>
    %cst_77 = arith.constant 9.99999974E-6 : f32
    %113 = vector.broadcast %cst_77 : f32 to vector<1x64xf32>
    %114 = arith.addf %111, %113 : vector<1x64xf32>
    %115 = math.rsqrt %114 : vector<1x64xf32>
    %116 = arith.mulf %112, %115 : vector<1x64xf32>
    %117 = vector.extract_strided_slice %1 {offsets = [2, 0], sizes = [1, 64], strides = [1, 1]} : vector<4x64xf32> to vector<1x64xf32>
    %118 = arith.mulf %107, %116 : vector<1x64xf32>
    %119 = arith.subf %117, %118 : vector<1x64xf32>
    %120 = vector.broadcast %116 : vector<1x64xf32> to vector<8x64xf32>
    %121 = arith.mulf %100, %120 : vector<8x64xf32>
    %122 = vector.broadcast %119 : vector<1x64xf32> to vector<8x64xf32>
    %123 = arith.addf %121, %122 : vector<8x64xf32>
    %cst_78 = arith.constant 0.000000e+00 : f32
    %124 = vector.broadcast %cst_78 : f32 to vector<8x64xf32>
    %125 = arith.maximumf %123, %124 : vector<8x64xf32>
    %126 = vector.shape_cast %125 : vector<8x64xf32> to vector<4x2x64xf32>
    %cst_79 = arith.constant dense<0xFF800000> : vector<4x64xf32>
    %127 = vector.multi_reduction <maximumf>, %126, %cst_79 [1] : vector<4x2x64xf32> to vector<4x64xf32>
    %cst_80 = arith.constant 0.000000e+00 : f32
    %128 = vector.broadcast %cst_80 : f32 to vector<2x1x64xf32>
    %c0_81 = arith.constant 0 : index
    %c0_82 = arith.constant 0 : index
    %c0_83 = arith.constant 0 : index
    %129 = vector.load %arg8[%c0_81, %c0_82, %c0_83] : memref<2x10x64xf32, #tpu.memory_space<vmem>>, vector<2x1x64xf32>
    tpu.vector_store %arg8[%c0_81, %c0_82, %c0_83], %128 {strides = array<i32>} : memref<2x10x64xf32, #tpu.memory_space<vmem>>, vector<2x1x64xf32>,
    %c0_84 = arith.constant 0 : index
    %c3 = arith.constant 3 : index
    %c0_85 = arith.constant 0 : index
    %130 = vector.load %arg8[%c0_84, %c3, %c0_85] : memref<2x10x64xf32, #tpu.memory_space<vmem>>, vector<2x1x64xf32>
    tpu.vector_store %arg8[%c0_84, %c3, %c0_85], %128 {strides = array<i32>} : memref<2x10x64xf32, #tpu.memory_space<vmem>>, vector<2x1x64xf32>,
    %131 = vector.shape_cast %127 : vector<4x64xf32> to vector<2x2x64xf32>
    %c0_86 = arith.constant 0 : index
    %c1_87 = arith.constant 1 : index
    %c0_88 = arith.constant 0 : index
    %132 = vector.load %arg8[%c0_86, %c1_87, %c0_88] : memref<2x10x64xf32, #tpu.memory_space<vmem>>, vector<2x2x64xf32>
    tpu.vector_store %arg8[%c0_86, %c1_87, %c0_88], %131 {strides = array<i32>} : memref<2x10x64xf32, #tpu.memory_space<vmem>>, vector<2x2x64xf32>,
    %cst_89 = arith.constant 0.000000e+00 : f32
    %133 = vector.broadcast %cst_89 : f32 to vector<4x64xf32>
    %c0_90 = arith.constant 0 : index
    %c0_91 = arith.constant 0 : index
    %c0_92 = arith.constant 0 : index
    %134 = vector.load %arg8[%c0_90, %c0_91, %c0_92] : memref<2x10x64xf32, #tpu.memory_space<vmem>>, vector<2x2x64xf32>
    %135 = vector.shape_cast %134 : vector<2x2x64xf32> to vector<4x64xf32>
    %c0_93 = arith.constant 0 : index
    %c0_94 = arith.constant 0 : index
    %136 = vector.load %arg4[%c0_93, %c0_94] : memref<192x64xf32, #tpu.memory_space<vmem>>, vector<64x64xf32>
    %cst_95 = arith.constant dense<0.000000e+00> : vector<4x64xf32>
    %137 = tpu.matmul %135, %136, %cst_95 {dimension_numbers = #tpu.dot_dimension_numbers<[1], [0], [0], [1], [0, 0, 1, 1], [], []>} : vector<4x64xf32>, vector<64x64xf32>, vector<4x64xf32> -> vector<4x64xf32>
    %138 = arith.addf %133, %137 : vector<4x64xf32>
    %c0_96 = arith.constant 0 : index
    %c1_97 = arith.constant 1 : index
    %c0_98 = arith.constant 0 : index
    %139 = vector.load %arg8[%c0_96, %c1_97, %c0_98] : memref<2x10x64xf32, #tpu.memory_space<vmem>>, vector<2x2x64xf32>
    %140 = vector.shape_cast %139 : vector<2x2x64xf32> to vector<4x64xf32>
    %c64_99 = arith.constant 64 : index
    %c0_100 = arith.constant 0 : index
    %141 = vector.load %arg4[%c64_99, %c0_100] : memref<192x64xf32, #tpu.memory_space<vmem>>, vector<64x64xf32>
    %cst_101 = arith.constant dense<0.000000e+00> : vector<4x64xf32>
    %142 = tpu.matmul %140, %141, %cst_101 {dimension_numbers = #tpu.dot_dimension_numbers<[1], [0], [0], [1], [0, 0, 1, 1], [], []>} : vector<4x64xf32>, vector<64x64xf32>, vector<4x64xf32> -> vector<4x64xf32>
    %143 = arith.addf %138, %142 : vector<4x64xf32>
    %c0_102 = arith.constant 0 : index
    %c2_103 = arith.constant 2 : index
    %c0_104 = arith.constant 0 : index
    %144 = vector.load %arg8[%c0_102, %c2_103, %c0_104] : memref<2x10x64xf32, #tpu.memory_space<vmem>>, vector<2x2x64xf32>
    %145 = vector.shape_cast %144 : vector<2x2x64xf32> to vector<4x64xf32>
    %c128_105 = arith.constant 128 : index
    %c0_106 = arith.constant 0 : index
    %146 = vector.load %arg4[%c128_105, %c0_106] : memref<192x64xf32, #tpu.memory_space<vmem>>, vector<64x64xf32>
    %cst_107 = arith.constant dense<0.000000e+00> : vector<4x64xf32>
    %147 = tpu.matmul %145, %146, %cst_107 {dimension_numbers = #tpu.dot_dimension_numbers<[1], [0], [0], [1], [0, 0, 1, 1], [], []>} : vector<4x64xf32>, vector<64x64xf32>, vector<4x64xf32> -> vector<4x64xf32>
    %148 = arith.addf %143, %147 : vector<4x64xf32>
    %cst_108 = arith.constant dense<0.000000e+00> : vector<64xf32>
    %149 = vector.multi_reduction <add>, %148, %cst_108 [0] : vector<4x64xf32> to vector<64xf32>
    %150 = vector.shape_cast %149 : vector<64xf32> to vector<1x64xf32>
    %151 = arith.mulf %148, %148 : vector<4x64xf32>
    %cst_109 = arith.constant dense<0.000000e+00> : vector<64xf32>
    %152 = vector.multi_reduction <add>, %151, %cst_109 [0] : vector<4x64xf32> to vector<64xf32>
    %153 = vector.shape_cast %152 : vector<64xf32> to vector<1x64xf32>
    %cst_110 = arith.constant 2.500000e-01 : f32
    %154 = vector.broadcast %cst_110 : f32 to vector<1x64xf32>
    %155 = arith.mulf %150, %154 : vector<1x64xf32>
    %cst_111 = arith.constant 2.500000e-01 : f32
    %156 = vector.broadcast %cst_111 : f32 to vector<1x64xf32>
    %157 = arith.mulf %153, %156 : vector<1x64xf32>
    %158 = arith.mulf %155, %155 : vector<1x64xf32>
    %159 = arith.subf %157, %158 : vector<1x64xf32>
    %160 = vector.extract_strided_slice %0 {offsets = [3, 0], sizes = [1, 64], strides = [1, 1]} : vector<4x64xf32> to vector<1x64xf32>
    %cst_112 = arith.constant 9.99999974E-6 : f32
    %161 = vector.broadcast %cst_112 : f32 to vector<1x64xf32>
    %162 = arith.addf %159, %161 : vector<1x64xf32>
    %163 = math.rsqrt %162 : vector<1x64xf32>
    %164 = arith.mulf %160, %163 : vector<1x64xf32>
    %165 = vector.extract_strided_slice %1 {offsets = [3, 0], sizes = [1, 64], strides = [1, 1]} : vector<4x64xf32> to vector<1x64xf32>
    %166 = arith.mulf %155, %164 : vector<1x64xf32>
    %167 = arith.subf %165, %166 : vector<1x64xf32>
    %168 = vector.broadcast %164 : vector<1x64xf32> to vector<4x64xf32>
    %169 = arith.mulf %148, %168 : vector<4x64xf32>
    %170 = vector.broadcast %167 : vector<1x64xf32> to vector<4x64xf32>
    %171 = arith.addf %169, %170 : vector<4x64xf32>
    %cst_113 = arith.constant 0.000000e+00 : f32
    %172 = vector.broadcast %cst_113 : f32 to vector<4x64xf32>
    %173 = arith.maximumf %171, %172 : vector<4x64xf32>
    %174 = vector.shape_cast %173 : vector<4x64xf32> to vector<2x2x64xf32>
    %cst_114 = arith.constant dense<0xFF800000> : vector<2x64xf32>
    %175 = vector.multi_reduction <maximumf>, %174, %cst_114 [1] : vector<2x2x64xf32> to vector<2x64xf32>
    %c0_115 = arith.constant 0 : index
    %c0_116 = arith.constant 0 : index
    %176 = vector.load %arg7[%c0_115, %c0_116] : memref<2x64xf32, #tpu.memory_space<vmem>>, vector<2x64xf32>
    tpu.vector_store %arg7[%c0_115, %c0_116], %175 {strides = array<i32>} : memref<2x64xf32, #tpu.memory_space<vmem>>, vector<2x64xf32>,
    return
  }
}

</mosaic_0001>

<bundles_post_ra>
// kernel: encoder_forward.1
= control target key start
LH: loop header
LB: loop body
LE: loop exit
PB: predicated region body
PF: predicated region fallthrough
CT: control target
= control target key end

     0   :  { %vm47_vm0 = vcmask 1042432   ;;  %vm34_vm1 = vcmask 23552   ;;  %s2597_s0 = inlined_call_operand.vmem [shape: f32[32,3], index: 0, kind: input, shape index: {}]   ;;  %s2598_s1 = inlined_call_operand.vmem [shape: f32[3,64], index: 1, kind: input, shape index: {}]   ;;  %s2599_s2 = inlined_call_operand.vmem [shape: f32[192,64], index: 2, kind: input, shape index: {}]   ;;  %s2600_s3 = inlined_call_operand.vmem [shape: f32[192,64], index: 3, kind: input, shape index: {}]   ;;  %s2601_s4 = inlined_call_operand.vmem [shape: f32[192,64], index: 4, kind: input, shape index: {}]   ;;  %s2602_s5 = inlined_call_operand.vmem [shape: f32[4,64], index: 5, kind: input, shape index: {}]   ;;  %s2603_s6 = inlined_call_operand.vmem [shape: f32[4,64], index: 6, kind: input, shape index: {}]   ;;  %s2604_s7 = inlined_call_operand.hbm [shape: f32[2,64], index: 7, kind: output, shape index: {}]  }
   0x1   :  { %v33_v0 = vld [vmem:[%s2598_s1] sm:$0x7]  ;;  %v30_v2 = vld [vmem:[%s2597_s0 + $0x8] sm:$0xff]  ;;  %v31_v3 = vld [vmem:[%s2597_s0 + $0x10] sm:$0xff] }
   0x2   :  { %v29_v1 = vld [vmem:[%s2597_s0] sm:$0xff]  ;;  %1701 = vmatprep.subr.msk.mxu0 %vm47_vm0, %v33_v0 }
   0x3   :  { %1703 = vmatprep.mubr.msk.f32.mxu0 %vm34_vm1, %v29_v1 }
   0x4   :  { %12 = vsyncpa [#allocation4], 0  ;;  %1702 = vmatpush3.msk.msra.mxu0 %vm47_vm0, %v33_v0  ;;  %v32_v4 = vld [vmem:[%s2597_s0 + $0x18] sm:$0xff]  ;;  %v445_v5 = vld [vmem:[%s2599_s2] sm:$0xff]  ;;  %vm397_vm2 = vcmask 516096   ;;  %v2057_v29 = vmov 0.0  }
   0x5   :  { %1704 = vmatmul.mubr.msk.f32.vlgmr.msra.gmra.mrb[0].mxu0 %vm34_vm1, %v30_v2  ;;  %v446_v6 = vld [vmem:[%s2599_s2 + $0x8] sm:$0xff]  ;;  %v455_v8 = vld [vmem:[%s2599_s2 + $0x40] sm:$0xff]  ;;  %v447_v11 = vld [vmem:[%s2599_s2 + $0x10] sm:$0xff]  ;;  %398 = vst.msk [vmem:[#allocation2] sm:$0x1] %vm397_vm2, %v2057_v29  ;;  %vm136_vm3 = vcmask 523264  }
   0x6   :  { %1706 = vmatprep.mubr.msk.f32.mxu0 %vm34_vm1, %v31_v3  ;;  %v1896_v7 = vpack.c.bf16 %v446_v6, %v445_v5  ;;  %v456_v9 = vld [vmem:[%s2599_s2 + $0x48] sm:$0xff]  ;;  %v448_v12 = vld [vmem:[%s2599_s2 + $0x18] sm:$0xff]  ;;  %v457_v14 = vld [vmem:[%s2599_s2 + $0x50] sm:$0xff]  ;;  %399 = vst.msk [vmem:[#allocation2 + $0x10] sm:$0x1] %vm397_vm2, %v2057_v29  ;;  %vm284_vm4 = vcmask 517120  }
   0x7   :  { %v1880_v10 = vpack.c.bf16 %v456_v9, %v455_v8  ;;  %v1900_v13 = vpack.c.bf16 %v448_v12, %v447_v11  ;;  %v458_v15 = vld [vmem:[%s2599_s2 + $0x58] sm:$0xff]  ;;  %v449_v17 = vld [vmem:[%s2599_s2 + $0x20] sm:$0xff]  ;;  %v450_v18 = vld [vmem:[%s2599_s2 + $0x28] sm:$0xff]  ;;  %400 = vst.msk [vmem:[#allocation2 + $0x9] sm:$0x1] %vm397_vm2, %v2057_v29  ;;  %v176_v8 = vlaneseq  ;;  %vm418_vm5 = vcmask 1041409  }
   0x8   :  { %1897 = vmatprep.subr.bf16.mxu1 %v1896_v7  ;;  %v1884_v16 = vpack.c.bf16 %v458_v15, %v457_v14  ;;  %v459_v19 = vld [vmem:[%s2599_s2 + $0x60] sm:$0xff]  ;;  %v1904_v20 = vpack.c.bf16 %v450_v18, %v449_v17  ;;  %v460_v21 = vld [vmem:[%s2599_s2 + $0x68] sm:$0xff]  ;;  %v451_v22 = vld [vmem:[%s2599_s2 + $0x30] sm:$0xff]  ;;  %401 = vst.msk [vmem:[#allocation2 + $0x19] sm:$0x1] %vm397_vm2, %v2057_v29  ;;  %vm420_vm6 = vcmask 1042434  }
   0x9   :  { %1707 = vmatmul.mubr.msk.f32.gmra.mrb[2].mxu0 %vm34_vm1, %v32_v4  ;;  %1899 = vmatpush3.bf16.msra.mxu1 %v1896_v7  ;;  %v452_v23 = vld [vmem:[%s2599_s2 + $0x38] sm:$0xff]  ;;  %v1888_v24 = vpack.c.bf16 %v460_v21, %v459_v19  ;;  %v461_v25 = vld [vmem:[%s2599_s2 + $0x70] sm:$0xff]  ;;  %v627_v30 = vld [vmem:[%s2599_s2 + $0x80] sm:$0xff]  ;;  %v2190_v9 = vshrl.u32 %v176_v8, 7  ;;  %vm422_vm7 = vcmask 1043459   ;;  %vm424_vm8 = vcmask 1044484  }
   0xa   :  { %1881 = vmatprep.subr.bf16.mxu0 %v1880_v10  ;;  %1901 = vmatprep.subr.bf16.mxu1 %v1900_v13  ;;  %v462_v26 = vld [vmem:[%s2599_s2 + $0x78] sm:$0xff]  ;;  %v1908_v27 = vpack.c.bf16 %v452_v23, %v451_v22  ;;  %v628_v31 = vld [vmem:[%s2599_s2 + $0x88] sm:$0xff]  ;;  %vm426_vm9 = vcmask 1045509   ;;  %vm428_vm10 = vcmask 1046534   ;;  %vm430_vm11 = vcmask 1047559  }
   0xb   :  { %1883 = vmatpush3.bf16.msra.mxu0 %v1880_v10  ;;  %v1892_v28 = vpack.c.bf16 %v462_v26, %v461_v25  ;;  %v2179_v32 = vpack.c.bf16 %v628_v31, %v627_v30  ;;  %v2195_v10 = vld [vmem:[%s2602_s5] sm:$0xf]  ;;  %v178_v11 = vsub.s32 0, %v2190_v9  ;;  %vm2060_vm12 = vmmov 0  }
   0xc   :  { %1885 = vmatprep.subr.bf16.mxu0 %v1884_v16  ;;  %vm881_vm13 = vcmask 519168  }
   0xd   :  { %1903 = vmatpush3.bf16.msra.mxu1 %v1900_v13  ;;  %v2058_v13 = vmov 1983009808  }
   0xe   :  { %1905 = vmatprep.subr.bf16.mxu1 %v1904_v20  ;;  %v202_v14 = vunpack.c.l.s4 %v2058_v13 }
   0xf   :  { %1887 = vmatpush3.bf16.msra.mxu0 %v1884_v16  ;;  %v2202_v16 = vld [vmem:[%s2603_s6] sm:$0xf] }
  0x10   :  { %1889 = vmatprep.subr.bf16.mxu0 %v1888_v24  ;;  %v203_v19 = vunpack.c.0.s8 %v202_v14 }
  0x11   :  { %1907 = vmatpush3.bf16.msra.mxu1 %v1904_v20 }
  0x12   :  { %1909 = vmatprep.subr.bf16.mxu1 %v1908_v27  ;;  %v2206_v26 = vsub.s32 %v203_v19, %v2190_v9 }
  0x13   :  { %1891 = vmatpush3.bf16.msra.mxu0 %v1888_v24 }
  0x14   :  { %1893 = vmatprep.subr.bf16.mxu0 %v1892_v28 }
  0x15   :  { %1911 = vmatpush3.bf16.msra.mxu1 %v1908_v27 }
  0x16   :  { %1913 = vmatprep.subr.bf16.mxu1 %v2179_v32 }
  0x17   :  { %1895 = vmatpush3.bf16.msra.mxu0 %v1892_v28 }
  0xd8   :  { %v1705_v33 = vpop.f32.mrb[0].mxu0 }
  0xd9   :  { %v138_v34 = vsel %vm136_vm3, %v1705_v33, 0.0  ;;  %v151_v35 = vmul.f32 %v1705_v33, %v1705_v33  ;;  %v117_v36 = vpop.f32.mrb[1].mxu0 }
  0xda   :  { %v137_v37 = vsel %vm136_vm3, %v117_v36, 0.0  ;;  %v150_v38 = vmul.f32 %v117_v36, %v117_v36 }
  0xdb   :  { %v155_v39 = vsel %vm136_vm3, %v151_v35, 0.0  ;;  %v139_v40 = vadd.f32 %v138_v34, %v137_v37 }
  0xdc   :  { %v154_v41 = vsel %vm136_vm3, %v150_v38, 0.0  ;;  %v1708_v42 = vpop.f32.mrb[2].mxu0 }
  0xdd   :  { %v156_v43 = vadd.f32 %v155_v39, %v154_v41  ;;  %v127_v44 = vpop.f32.mrb[3].mxu0  ;;  %v153_v45 = vmul.f32 %v1708_v42, %v1708_v42  ;;  %v142_v49 = vsel %vm136_vm3, %v1708_v42, 0.0 }
  0xde   :  { %v140_v46 = vsel %vm136_vm3, %v127_v44, 0.0  ;;  %v152_v47 = vmul.f32 %v127_v44, %v127_v44 }
  0xdf   :  { %v141_v48 = vadd.f32 %v140_v46, %v139_v40  ;;  %v159_v53 = vsel %vm136_vm3, %v153_v45, 0.0 }
  0xe0   :  { %v157_v50 = vsel %vm136_vm3, %v152_v47, 0.0 }
  0xe1   :  { %v143_v51 = vadd.f32 %v142_v49, %v141_v48  ;;  %v158_v52 = vadd.f32 %v157_v50, %v156_v43 }
  0xe3   :  { %v144_v54 = vrot.slane %v143_v51, 4  ;;  %v160_v55 = vadd.f32 %v159_v53, %v158_v52 }
  0xe5   :  { %v145_v56 = vadd.f32 %v144_v54, %v143_v51  ;;  %v161_v57 = vrot.slane %v160_v55, 4 }
  0xe7   :  { %v146_v58 = vrot.slane %v145_v56, 2  ;;  %v162_v59 = vadd.f32 %v161_v57, %v160_v55 }
  0xe9   :  { %v147_v60 = vadd.f32 %v146_v58, %v145_v56  ;;  %v163_v61 = vrot.slane %v162_v59, 2 }
  0xeb   :  { %v148_v62 = vrot.slane %v147_v60, 1  ;;  %v164_v63 = vadd.f32 %v163_v61, %v162_v59 }
  0xed   :  { %v149_v0 = vadd.f32 %v148_v62, %v147_v60  ;;  %v165_v1 = vrot.slane %v164_v63, 1 }
  0xef   :  { %v166_v2 = vadd.f32 %v165_v1, %v164_v63  ;;  %v167_v3 = vmul.f32 0.03125, %v149_v0 }
  0xf1   :  { %v168_v4 = vmul.f32 0.03125, %v166_v2  ;;  %v169_v5 = vmul.f32 %v167_v3, %v167_v3 }
  0xf3   :  { %v170_v6 = vsub.f32 %v168_v4, %v169_v5 }
  0xf5   :  { %v171_v7 = vadd.f32 1e-05, %v170_v6 }
  0xf7   :  { %2023 = vrsqrt.f32 %v171_v7 }
 0x101   :  { %v2024_v12 = vpop.eup %2023 }
 0x102   :  { %v173_v15 = vmul.f32 %v2024_v12, %v2195_v10 }
 0x104   :  { %v174_v17 = vmul.f32 %v173_v15, %v167_v3  ;;  %v179_v18 = vrot.slane %v173_v15, %v178_v11 }
 0x106   :  { %v175_v20 = vsub.f32 %v2202_v16, %v174_v17  ;;  %v180_v21 = vmul.f32 %v179_v18, %v117_v36  ;;  %v181_v22 = vmul.f32 %v1705_v33, %v179_v18  ;;  %v182_v23 = vmul.f32 %v179_v18, %v127_v44 }
 0x107   :  { %v183_v24 = vmul.f32 %v1708_v42, %v179_v18 }
 0x108   :  { %v187_v25 = vrot.slane %v175_v20, %v178_v11 }
 0x10a   :  { %v188_v27 = vadd.f32 %v187_v25, %v180_v21  ;;  %v189_v28 = vadd.f32 %v187_v25, %v181_v22  ;;  %v190_v30 = vadd.f32 %v187_v25, %v182_v23  ;;  %v191_v31 = vadd.f32 %v187_v25, %v183_v24 }
 0x10c   :  { %v192_v34 = vmax.f32 %v188_v27, 0.0  ;;  %v193_v35 = vmax.f32 %v189_v28, 0.0  ;;  %v194_v37 = vmax.f32 %v190_v30, 0.0  ;;  %v195_v38 = vmax.f32 %v191_v31, 0.0 }
 0x10e   :  { %v200_v39 = vcombine.high %v192_v34, %v192_v34  ;;  %v207_v40 = vrot.slane %v192_v34, %v2206_v26  ;;  %v217_v36 = vcombine.high %v193_v35, %v193_v35  ;;  %v224_v33 = vrot.slane %v193_v35, %v2206_v26 }
 0x10f   :  { %v234_v41 = vcombine.high %v194_v37, %v194_v37  ;;  %v2211_v42 = vrot.slane %v194_v37, %v2206_v26  ;;  %v251_v43 = vcombine.high %v195_v38, %v195_v38  ;;  %v2214_v44 = vrot.slane %v195_v38, %v2206_v26 }
 0x110   :  { %v214_v45 = vrot.slane %v200_v39, %v2206_v26  ;;  %v215_v46 = vcombine.high %v207_v40, %v207_v40  ;;  %v231_v47 = vrot.slane %v217_v36, %v2206_v26  ;;  %v232_v48 = vcombine.high %v224_v33, %v224_v33 }
 0x111   :  { %v2219_v49 = vrot.slane %v234_v41, %v2206_v26  ;;  %v249_v50 = vcombine.high %v2211_v42, %v2211_v42  ;;  %v285_v53 = vsel %vm284_vm4, %v207_v40, -inf  ;;  %v2226_v55 = vrot.slane %v251_v43, %v2206_v26 }
 0x112   :  { %v216_v51 = vcombine.high %v214_v45, %v214_v45  ;;  %v233_v52 = vcombine.high %v231_v47, %v231_v47  ;;  %v292_v54 = vsel %vm284_vm4, %v215_v46, -inf  ;;  %v266_v56 = vcombine.high %v2214_v44, %v2214_v44 }
 0x113   :  { %v286_v57 = vrot.slane %v285_v53, 4  ;;  %v293_v58 = vrot.slane %v292_v54, 4  ;;  %v299_v59 = vsel %vm284_vm4, %v214_v45, -inf  ;;  %v313_v61 = vsel %vm284_vm4, %v224_v33, -inf }
 0x114   :  { %v306_v60 = vsel %vm284_vm4, %v216_v51, -inf  ;;  %v320_v62 = vsel %vm284_vm4, %v232_v48, -inf  ;;  %v300_v1 = vrot.slane %v299_v59, 4  ;;  %v314_v3 = vrot.slane %v313_v61, 4 }
 0x115   :  { %v287_v63 = vmax.f32 %v285_v53, %v286_v57  ;;  %v294_v0 = vmax.f32 %v292_v54, %v293_v58  ;;  %v307_v2 = vrot.slane %v306_v60, 4  ;;  %v321_v4 = vrot.slane %v320_v62, 4 }
 0x116   :  { %v327_v5 = vsel %vm284_vm4, %v231_v47, -inf  ;;  %v334_v6 = vsel %vm284_vm4, %v233_v52, -inf  ;;  %v301_v11 = vmax.f32 %v299_v59, %v300_v1  ;;  %v315_v13 = vmax.f32 %v313_v61, %v314_v3 }
 0x117   :  { %v288_v7 = vrot.slane %v287_v63, 2  ;;  %v295_v8 = vrot.slane %v294_v0, 2  ;;  %v308_v12 = vmax.f32 %v306_v60, %v307_v2  ;;  %v322_v14 = vmax.f32 %v320_v62, %v321_v4 }
 0x118   :  { %v328_v15 = vrot.slane %v327_v5, 4  ;;  %v335_v17 = vrot.slane %v334_v6, 4  ;;  %v302_v20 = vrot.slane %v301_v11, 2  ;;  %v316_v22 = vrot.slane %v315_v13, 2 }
 0x119   :  { %v289_v18 = vmax.f32 %v287_v63, %v288_v7  ;;  %v296_v19 = vmax.f32 %v294_v0, %v295_v8  ;;  %v309_v21 = vrot.slane %v308_v12, 2  ;;  %v323_v23 = vrot.slane %v322_v14, 2 }
 0x11a   :  { %v329_v24 = vmax.f32 %v327_v5, %v328_v15  ;;  %v336_v25 = vmax.f32 %v334_v6, %v335_v17  ;;  %v303_v30 = vmax.f32 %v301_v11, %v302_v20  ;;  %v317_v34 = vmax.f32 %v315_v13, %v316_v22 }
 0x11b   :  { %v290_v27 = vrot.slane %v289_v18, 1  ;;  %v297_v28 = vrot.slane %v296_v19, 1  ;;  %v310_v31 = vmax.f32 %v308_v12, %v309_v21  ;;  %v324_v35 = vmax.f32 %v322_v14, %v323_v23 }
 0x11c   :  { %v330_v37 = vrot.slane %v329_v24, 2  ;;  %v337_v38 = vrot.slane %v336_v25, 2  ;;  %v250_v39 = vcombine.high %v2219_v49, %v2219_v49  ;;  %v267_v40 = vcombine.high %v2226_v55, %v2226_v55 }
 0x11d   :  { %v304_v36 = vrot.slane %v303_v30, 1  ;;  %v311_v33 = vrot.slane %v310_v31, 1  ;;  %v318_v41 = vrot.slane %v317_v34, 1  ;;  %v325_v43 = vrot.slane %v324_v35, 1 }
 0x11e   :  { %v2240_v45 = vmax.f32 %v329_v24, %v330_v37  ;;  %v2242_v46 = vmax.f32 %v336_v25, %v337_v38  ;;  %v2244_v47 = vmax.f32 %v289_v18, %v290_v27  ;;  %v2246_v48 = vmax.f32 %v296_v19, %v297_v28 }
 0x11f   :  { %v341_v51 = vsel %vm284_vm4, %v2211_v42, -inf  ;;  %v348_v52 = vsel %vm284_vm4, %v249_v50, -inf  ;;  %v2251_v53 = vmax.f32 %v303_v30, %v304_v36  ;;  %v2253_v54 = vmax.f32 %v310_v31, %v311_v33 }
 0x120   :  { %v2255_v57 = vmax.f32 %v317_v34, %v318_v41  ;;  %v2257_v58 = vmax.f32 %v324_v35, %v325_v43  ;;  %v342_v59 = vrot.slane %v341_v51, 4  ;;  %v349_v60 = vrot.slane %v348_v52, 4 }
 0x121   :  { %v355_v61 = vsel %vm284_vm4, %v2219_v49, -inf  ;;  %v362_v62 = vsel %vm284_vm4, %v250_v39, -inf  ;;  %v332_v63 = vrot.slane %v2240_v45, 1  ;;  %v339_v42 = vrot.slane %v2242_v46, 1 }
 0x122   :  { %v356_v50 = vrot.slane %v355_v61, 4  ;;  %v363_v0 = vrot.slane %v362_v62, 4  ;;  %v343_v1 = vmax.f32 %v341_v51, %v342_v59  ;;  %v350_v2 = vmax.f32 %v348_v52, %v349_v60 }
 0x123   :  { %v369_v3 = vsel %vm284_vm4, %v2214_v44, -inf  ;;  %v376_v4 = vsel %vm284_vm4, %v266_v56, -inf  ;;  %v383_v12 = vsel %vm284_vm4, %v2226_v55, -inf  ;;  %v390_v13 = vsel %vm284_vm4, %v267_v40, -inf }
 0x124   :  { %v357_v49 = vmax.f32 %v355_v61, %v356_v50  ;;  %v364_v5 = vmax.f32 %v362_v62, %v363_v0  ;;  %v370_v6 = vrot.slane %v369_v3, 4  ;;  %v377_v7 = vrot.slane %v376_v4, 4 }
 0x125   :  { %v344_v8 = vrot.slane %v343_v1, 2  ;;  %v351_v11 = vrot.slane %v350_v2, 2  ;;  %v384_v19 = vrot.slane %v383_v12, 4  ;;  %v391_v20 = vrot.slane %v390_v13, 4 }
 0x126   :  { %v358_v14 = vrot.slane %v357_v49, 2  ;;  %v365_v15 = vrot.slane %v364_v5, 2  ;;  %v371_v17 = vmax.f32 %v369_v3, %v370_v6  ;;  %v378_v44 = vmax.f32 %v376_v4, %v377_v7 }
 0x127   :  { %v345_v56 = vmax.f32 %v343_v1, %v344_v8  ;;  %v352_v18 = vmax.f32 %v350_v2, %v351_v11  ;;  %v385_v55 = vmax.f32 %v383_v12, %v384_v19  ;;  %v392_v28 = vmax.f32 %v390_v13, %v391_v20  ;;  %v632_v11 = vld [vmem:[%s2599_s2 + $0xa8] sm:$0xff]  ;;  %v633_v19 = vld [vmem:[%s2599_s2 + $0xb0] sm:$0xff]  ;;  %v634_v20 = vld [vmem:[%s2599_s2 + $0xb8] sm:$0xff] }
 0x128   :  { %v359_v21 = vmax.f32 %v357_v49, %v358_v14  ;;  %v366_v22 = vmax.f32 %v364_v5, %v365_v15  ;;  %v372_v23 = vrot.slane %v371_v17, 2  ;;  %v379_v24 = vrot.slane %v378_v44, 2 }
 0x129   :  { %v346_v25 = vrot.slane %v345_v56, 1  ;;  %v353_v27 = vrot.slane %v352_v18, 1  ;;  %v386_v39 = vrot.slane %v385_v55, 2  ;;  %v393_v40 = vrot.slane %v392_v28, 2 }
 0x12a   :  { %v360_v30 = vrot.slane %v359_v21, 1  ;;  %v367_v31 = vrot.slane %v366_v22, 1  ;;  %v373_v34 = vmax.f32 %v371_v17, %v372_v23  ;;  %v380_v35 = vmax.f32 %v378_v44, %v379_v24 }
 0x12b   :  { %v347_v37 = vmax.f32 %v345_v56, %v346_v25  ;;  %v354_v38 = vmax.f32 %v352_v18, %v353_v27  ;;  %v387_v51 = vmax.f32 %v385_v55, %v386_v39  ;;  %v394_v52 = vmax.f32 %v392_v28, %v393_v40  ;;  %v898_v25 = vld [vmem:[%s2600_s3 + $0x50] sm:$0xff]  ;;  %v899_v27 = vld [vmem:[%s2600_s3 + $0x58] sm:$0xff]  ;;  %v900_v28 = vld [vmem:[%s2600_s3 + $0x60] sm:$0xff] }
 0x12c   :  { %v361_v36 = vmax.f32 %v359_v21, %v360_v30  ;;  %v368_v33 = vmax.f32 %v366_v22, %v367_v31  ;;  %v374_v41 = vrot.slane %v373_v34, 1  ;;  %v381_v43 = vrot.slane %v380_v35, 1  ;;  %v897_v22 = vld [vmem:[%s2600_s3 + $0x48] sm:$0xff] }
 0x12d   :  { %v419_v59 = vsel %vm418_vm5, %v2246_v48, %v2244_v47  ;;  %v432_v60 = vsel %vm418_vm5, %v354_v38, %v347_v37  ;;  %v388_v1 = vrot.slane %v387_v51, 1  ;;  %v395_v2 = vrot.slane %v394_v52, 1  ;;  %v901_v30 = vld [vmem:[%s2600_s3 + $0x68] sm:$0xff] }
 0x12e   :  { %v375_v61 = vmax.f32 %v373_v34, %v374_v41  ;;  %v382_v62 = vmax.f32 %v380_v35, %v381_v43  ;;  %v421_v50 = vsel %vm420_vm6, %v2251_v53, %v419_v59  ;;  %v433_v0 = vsel %vm420_vm6, %v361_v36, %v432_v60  ;;  %v902_v34 = vld [vmem:[%s2600_s3 + $0x70] sm:$0xff]  ;;  %v903_v35 = vld [vmem:[%s2600_s3 + $0x78] sm:$0xff] }
 0x12f   :  { %v423_v3 = vsel %vm422_vm7, %v2253_v54, %v421_v50  ;;  %v434_v4 = vsel %vm422_vm7, %v368_v33, %v433_v0  ;;  %v333_v47 = vmax.f32 %v2240_v45, %v332_v63  ;;  %v340_v53 = vmax.f32 %v2242_v46, %v339_v42  ;;  %v629_v46 = vld [vmem:[%s2599_s2 + $0x90] sm:$0xff]  ;;  %v631_v42 = vld [vmem:[%s2599_s2 + $0xa0] sm:$0xff] }
 0x130   :  { %v425_v48 = vsel %vm424_vm8, %v2255_v57, %v423_v3  ;;  %v435_v49 = vsel %vm424_vm8, %v375_v61, %v434_v4  ;;  %v389_v5 = vmax.f32 %v387_v51, %v388_v1  ;;  %v396_v7 = vmax.f32 %v394_v52, %v395_v2 }
 0x131   :  { %v427_v54 = vsel %vm426_vm9, %v2257_v58, %v425_v48  ;;  %v436_v6 = vsel %vm426_vm9, %v382_v62, %v435_v49  ;;  %v630_v58 = vld [vmem:[%s2599_s2 + $0x98] sm:$0xff]  ;;  %v1920_v18 = vpack.c.bf16 %v632_v11, %v631_v42  ;;  %v1924_v21 = vpack.c.bf16 %v634_v20, %v633_v19 }
 0x132   :  { %v429_v8 = vsel %vm428_vm10, %v333_v47, %v427_v54  ;;  %v437_v63 = vsel %vm428_vm10, %v389_v5, %v436_v6  ;;  %v1916_v15 = vpack.c.bf16 %v630_v58, %v629_v46  ;;  %v2059_v24 = vmov 0.0|0.0  }
 0x133   :  { %v431_v45 = vsel %vm430_vm11, %v340_v53, %v429_v8  ;;  %v438_v57 = vsel %vm430_vm11, %v396_v7, %v437_v63  ;;  %1928 = vmatprep.subr.bf16.mxu0 %v2059_v24  ;;  %v1932_v55 = vpack.c.bf16 %v899_v27, %v898_v25  ;;  %v1935_v31 = vpack.c.bf16 %v901_v30, %v900_v28 }
 0x134   :  { %441 = vst.msk [vmem:[#allocation2 + $0x1] sm:$0xff] %vm136_vm3, %v431_v45  ;;  %442 = vst.msk [vmem:[#allocation2 + $0x11] sm:$0xff] %vm136_vm3, %v438_v57  ;;  %v1938_v37 = vpack.c.bf16 %v903_v35, %v902_v34  ;;  %v749_v46 = vsub.s32 1, %v2190_v9 }
 0x13b   :  { %v453_v12 = vld [vmem:[#allocation2 + $0x1] sm:$0xff]  ;;  %v454_v17 = vld [vmem:[#allocation2 + $0x11] sm:$0xff] }
 0x13c   :  { %v443_v13 = vld [vmem:[#allocation2] sm:$0xff]  ;;  %1725 = vmatprep.mubr.msk.f32.mxu0 %vm136_vm3, %v453_v12  ;;  %v444_v44 = vld [vmem:[#allocation2 + $0x10] sm:$0xff] }
 0x13d   :  { %v625_v14 = vld [vmem:[#allocation2 + $0x2] sm:$0xff]  ;;  %1744 = vmatprep.mubr.msk.f32.mxu1 %vm136_vm3, %v443_v13  ;;  %861 = vst.msk [vmem:[#allocation2] sm:$0x1] %vm397_vm2, %v2057_v29  ;;  %v626_v56 = vld [vmem:[#allocation2 + $0x12] sm:$0xff]  ;;  %1726 = vmatmul.mubr.msk.f32.vlgmr.msra.gmra.mrb[4].mxu0 %vm136_vm3, %v454_v17  ;;  %862 = vst.msk [vmem:[#allocation2 + $0x10] sm:$0x1] %vm397_vm2, %v2057_v29 }
 0x13e   :  { %863 = vst.msk [vmem:[#allocation2 + $0x5] sm:$0x1] %vm397_vm2, %v2057_v29  ;;  %1745 = vmatmul.mubr.msk.f32.vlgmr.msra.gmra.mrb[0].mxu1 %vm136_vm3, %v444_v44  ;;  %864 = vst.msk [vmem:[#allocation2 + $0x15] sm:$0x1] %vm397_vm2, %v2057_v29  ;;  %1782 = vmatprep.mubr.msk.f32.mxu0 %vm2060_vm12, %v2057_v29 }
 0x13f   :  { %1915 = vmatpush3.bf16.msra.mxu1 %v2179_v32  ;;  %1763 = vmatprep.mubr.msk.f32.mxu1 %vm136_vm3, %v625_v14  ;;  %v896_v32 = vld [vmem:[%s2600_s3 + $0x40] sm:$0xff] }
 0x140   :  { %1917 = vmatprep.subr.bf16.mxu1 %v1916_v15  ;;  %v1929_v23 = vpack.c.bf16 %v897_v22, %v896_v32 }
 0x142   :  { %1930 = vmatpush3.bf16.msra.mxu0 %v1929_v23 }
 0x143   :  { %1919 = vmatpush3.bf16.msra.mxu1 %v1916_v15  ;;  %1931 = vmatprep.subr.bf16.mxu0 %v2059_v24 }
 0x144   :  { %1921 = vmatprep.subr.bf16.mxu1 %v1920_v18 }
 0x146   :  { %1933 = vmatpush3.bf16.msra.mxu0 %v1932_v55 }
 0x147   :  { %1923 = vmatpush3.bf16.msra.mxu1 %v1920_v18  ;;  %1934 = vmatprep.subr.bf16.mxu0 %v2059_v24 }
 0x148   :  { %1925 = vmatprep.subr.bf16.mxu1 %v1924_v21 }
 0x14a   :  { %1936 = vmatpush3.bf16.msra.mxu0 %v1935_v31 }
 0x14b   :  { %1927 = vmatpush3.bf16.msra.mxu1 %v1924_v21  ;;  %1937 = vmatprep.subr.bf16.mxu0 %v2059_v24 }
 0x14c   :  { %1964 = vmatprep.subr.bf16.mxu1 %v2059_v24 }
 0x14e   :  { %1764 = vmatmul.mubr.msk.f32.vlgmr.msra.gmra.mrb[0].mxu1 %vm136_vm3, %v626_v56  ;;  %1939 = vmatpush3.bf16.msra.mxu0 %v1938_v37 }
 0x14f   :  { %1839 = vmatprep.mubr.msk.f32.mxu1 %vm2060_vm12, %v2057_v29  ;;  %1940 = vmatprep.subr.bf16.mxu0 %v2059_v24 }
 0x210   :  { %v1727_v38 = vpop.f32.mrb[4].mxu0 }
 0x211   :  { %v535_v39 = vpop.f32.mrb[5].mxu0 }
 0x221   :  { %v1765_v40 = vpop.f32.mrb[0].mxu1 }
 0x222   :  { %v2000_v36 = vadd.f32 %v1765_v40, %v1727_v38  ;;  %v707_v33 = vpop.f32.mrb[1].mxu1 }
 0x223   :  { %v2001_v41 = vadd.f32 %v707_v33, %v535_v39 }
 0x224   :  { %v719_v43 = vsel %vm136_vm3, %v2000_v36, 0.0  ;;  %v728_v51 = vmul.f32 %v2000_v36, %v2000_v36 }
 0x225   :  { %v718_v52 = vsel %vm136_vm3, %v2001_v41, 0.0  ;;  %v727_v59 = vmul.f32 %v2001_v41, %v2001_v41 }
 0x226   :  { %v730_v60 = vsel %vm136_vm3, %v728_v51, 0.0  ;;  %v720_v61 = vadd.f32 %v719_v43, %v718_v52 }
 0x227   :  { %v729_v62 = vsel %vm136_vm3, %v727_v59, 0.0 }
 0x228   :  { %v721_v50 = vrot.slane %v720_v61, 4  ;;  %v731_v0 = vadd.f32 %v730_v60, %v729_v62 }
 0x22a   :  { %v722_v1 = vadd.f32 %v721_v50, %v720_v61  ;;  %v732_v2 = vrot.slane %v731_v0, 4 }
 0x22c   :  { %v723_v3 = vrot.slane %v722_v1, 2  ;;  %v733_v4 = vadd.f32 %v732_v2, %v731_v0 }
 0x22e   :  { %v724_v47 = vadd.f32 %v723_v3, %v722_v1  ;;  %v734_v48 = vrot.slane %v733_v4, 2 }
 0x230   :  { %v725_v49 = vrot.slane %v724_v47, 1  ;;  %v735_v53 = vadd.f32 %v734_v48, %v733_v4 }
 0x232   :  { %v726_v5 = vadd.f32 %v725_v49, %v724_v47  ;;  %v736_v54 = vrot.slane %v735_v53, 1 }
 0x234   :  { %v737_v6 = vadd.f32 %v736_v54, %v735_v53  ;;  %v738_v7 = vmul.f32 0.0625, %v726_v5 }
 0x236   :  { %v739_v8 = vmul.f32 0.0625, %v737_v6  ;;  %v740_v45 = vmul.f32 %v738_v7, %v738_v7 }
 0x238   :  { %v741_v63 = vsub.f32 %v739_v8, %v740_v45 }
 0x23a   :  { %v742_v57 = vadd.f32 1e-05, %v741_v63 }
 0x23c   :  { %2025 = vrsqrt.f32 %v742_v57 }
 0x246   :  { %v2026_v58 = vpop.eup %2025 }
 0x247   :  { %v744_v42 = vmul.f32 %v2026_v58, %v2195_v10 }
 0x249   :  { %v745_v11 = vmul.f32 %v744_v42, %v738_v7  ;;  %v750_v12 = vrot.slane %v744_v42, %v749_v46 }
 0x24b   :  { %v746_v13 = vsub.f32 %v2202_v16, %v745_v11  ;;  %v751_v14 = vmul.f32 %v2001_v41, %v750_v12  ;;  %v752_v15 = vmul.f32 %v2000_v36, %v750_v12 }
 0x24d   :  { %v756_v17 = vrot.slane %v746_v13, %v749_v46 }
 0x24f   :  { %v757_v44 = vadd.f32 %v756_v17, %v751_v14  ;;  %v758_v56 = vadd.f32 %v756_v17, %v752_v15 }
 0x251   :  { %v759_v18 = vmax.f32 %v757_v44, 0.0  ;;  %v760_v19 = vmax.f32 %v758_v56, 0.0 }
 0x253   :  { %v763_v20 = vcombine.high %v759_v18, %v759_v18  ;;  %v770_v21 = vrot.slane %v759_v18, %v2206_v26  ;;  %v780_v32 = vcombine.high %v760_v19, %v760_v19  ;;  %v787_v22 = vrot.slane %v760_v19, %v2206_v26 }
 0x255   :  { %v777_v23 = vrot.slane %v763_v20, %v2206_v26  ;;  %v778_v25 = vcombine.high %v770_v21, %v770_v21  ;;  %v794_v27 = vrot.slane %v780_v32, %v2206_v26  ;;  %v795_v55 = vcombine.high %v787_v22, %v787_v22 }
 0x256   :  { %v805_v28 = vsel %vm284_vm4, %v770_v21, -inf  ;;  %v833_v30 = vsel %vm284_vm4, %v787_v22, -inf }
 0x257   :  { %v779_v31 = vcombine.high %v777_v23, %v777_v23  ;;  %v796_v34 = vcombine.high %v794_v27, %v794_v27  ;;  %v806_v35 = vrot.slane %v805_v28, 4  ;;  %v812_v37 = vsel %vm284_vm4, %v778_v25, -inf }
 0x258   :  { %v813_v38 = vrot.slane %v812_v37, 4  ;;  %v819_v39 = vsel %vm284_vm4, %v777_v23, -inf  ;;  %v834_v40 = vrot.slane %v833_v30, 4  ;;  %v840_v36 = vsel %vm284_vm4, %v795_v55, -inf }
 0x259   :  { %v807_v33 = vmax.f32 %v805_v28, %v806_v35  ;;  %v820_v41 = vrot.slane %v819_v39, 4  ;;  %v826_v43 = vsel %vm284_vm4, %v779_v31, -inf  ;;  %v841_v51 = vrot.slane %v840_v36, 4 }
 0x25a   :  { %v814_v52 = vmax.f32 %v812_v37, %v813_v38  ;;  %v827_v59 = vrot.slane %v826_v43, 4  ;;  %v835_v60 = vmax.f32 %v833_v30, %v834_v40  ;;  %v847_v61 = vsel %vm284_vm4, %v794_v27, -inf  ;;  %v886_v38 = vld [vmem:[%s2600_s3] sm:$0xff] }
 0x25b   :  { %v808_v62 = vrot.slane %v807_v33, 2  ;;  %v821_v50 = vmax.f32 %v819_v39, %v820_v41  ;;  %v842_v0 = vmax.f32 %v840_v36, %v841_v51  ;;  %v848_v1 = vrot.slane %v847_v61, 4  ;;  %v887_v39 = vld [vmem:[%s2600_s3 + $0x8] sm:$0xff]  ;;  %v888_v36 = vld [vmem:[%s2600_s3 + $0x10] sm:$0xff] }
 0x25c   :  { %v815_v2 = vrot.slane %v814_v52, 2  ;;  %v828_v3 = vmax.f32 %v826_v43, %v827_v59  ;;  %v836_v4 = vrot.slane %v835_v60, 2  ;;  %v854_v47 = vsel %vm284_vm4, %v796_v34, -inf  ;;  %v890_v59 = vld [vmem:[%s2600_s3 + $0x20] sm:$0xff] }
 0x25d   :  { %v809_v48 = vmax.f32 %v807_v33, %v808_v62  ;;  %v822_v49 = vrot.slane %v821_v50, 2  ;;  %v843_v53 = vrot.slane %v842_v0, 2  ;;  %v849_v5 = vmax.f32 %v847_v61, %v848_v1  ;;  %v889_v33 = vld [vmem:[%s2600_s3 + $0x18] sm:$0xff]  ;;  %v892_v62 = vld [vmem:[%s2600_s3 + $0x30] sm:$0xff]  ;;  %v1056_v1 = vld [vmem:[%s2600_s3 + $0x80] sm:$0xff] }
 0x25e   :  { %v816_v54 = vmax.f32 %v814_v52, %v815_v2  ;;  %v829_v6 = vrot.slane %v828_v3, 2  ;;  %v837_v7 = vmax.f32 %v835_v60, %v836_v4  ;;  %v855_v8 = vrot.slane %v854_v47, 4  ;;  %v891_v60 = vld [vmem:[%s2600_s3 + $0x28] sm:$0xff]  ;;  %v1058_v4 = vld [vmem:[%s2600_s3 + $0x90] sm:$0xff] }
 0x25f   :  { %v810_v45 = vrot.slane %v809_v48, 1  ;;  %v823_v63 = vmax.f32 %v821_v50, %v822_v49  ;;  %v844_v57 = vmax.f32 %v842_v0, %v843_v53  ;;  %v850_v46 = vrot.slane %v849_v5, 2  ;;  %v893_v50 = vld [vmem:[%s2600_s3 + $0x38] sm:$0xff]  ;;  %v1057_v2 = vld [vmem:[%s2600_s3 + $0x88] sm:$0xff]  ;;  %v1060_v49 = vld [vmem:[%s2600_s3 + $0xa0] sm:$0xff] }
 0x260   :  { %v817_v58 = vrot.slane %v816_v54, 1  ;;  %v830_v42 = vmax.f32 %v828_v3, %v829_v6  ;;  %v838_v11 = vrot.slane %v837_v7, 1  ;;  %v856_v12 = vmax.f32 %v854_v47, %v855_v8  ;;  %v1059_v47 = vld [vmem:[%s2600_s3 + $0x98] sm:$0xff]  ;;  %v1061_v53 = vld [vmem:[%s2600_s3 + $0xa8] sm:$0xff]  ;;  %v1251_v8 = vld [vmem:[%s2601_s4 + $0x40] sm:$0xff] }
 0x261   :  { %v824_v13 = vrot.slane %v823_v63, 1  ;;  %v845_v14 = vrot.slane %v844_v57, 1  ;;  %v851_v15 = vmax.f32 %v849_v5, %v850_v46  ;;  %v811_v17 = vmax.f32 %v809_v48, %v810_v45  ;;  %v1063_v6 = vld [vmem:[%s2600_s3 + $0xb8] sm:$0xff]  ;;  %v1252_v45 = vld [vmem:[%s2601_s4 + $0x48] sm:$0xff] }
 0x262   :  { %v818_v44 = vmax.f32 %v816_v54, %v817_v58  ;;  %v831_v56 = vrot.slane %v830_v42, 1  ;;  %v857_v18 = vrot.slane %v856_v12, 2  ;;  %v839_v20 = vmax.f32 %v837_v7, %v838_v11  ;;  %v1062_v54 = vld [vmem:[%s2600_s3 + $0xb0] sm:$0xff]  ;;  %v1254_v46 = vld [vmem:[%s2601_s4 + $0x58] sm:$0xff]  ;;  %v1256_v11 = vld [vmem:[%s2601_s4 + $0x68] sm:$0xff] }
 0x263   :  { %v825_v19 = vmax.f32 %v823_v63, %v824_v13  ;;  %v846_v21 = vmax.f32 %v844_v57, %v845_v14  ;;  %v852_v32 = vrot.slane %v851_v15, 1  ;;  %v1941_v40 = vpack.c.bf16 %v887_v39, %v886_v38  ;;  %v1253_v57 = vld [vmem:[%s2601_s4 + $0x50] sm:$0xff]  ;;  %v1258_v14 = vld [vmem:[%s2601_s4 + $0x78] sm:$0xff] }
 0x264   :  { %v832_v22 = vmax.f32 %v830_v42, %v831_v56  ;;  %v858_v23 = vmax.f32 %v856_v12, %v857_v18  ;;  %v873_v25 = vsel %vm418_vm5, %v818_v44, %v811_v17  ;;  %v1944_v52 = vpack.c.bf16 %v889_v33, %v888_v36  ;;  %v1255_v42 = vld [vmem:[%s2601_s4 + $0x60] sm:$0xff]  ;;  %v1257_v12 = vld [vmem:[%s2601_s4 + $0x70] sm:$0xff] }
 0x265   :  { %v853_v27 = vmax.f32 %v851_v15, %v852_v32  ;;  %v874_v55 = vsel %vm420_vm6, %v825_v19, %v873_v25  ;;  %v876_v28 = vsel %vm418_vm5, %v846_v21, %v839_v20  ;;  %v1947_v61 = vpack.c.bf16 %v891_v60, %v890_v59 }
 0x266   :  { %v859_v30 = vrot.slane %v858_v23, 1  ;;  %v875_v31 = vsel %vm422_vm7, %v832_v22, %v874_v55  ;;  %v1950_v0 = vpack.c.bf16 %v893_v50, %v892_v62  ;;  %v1953_v3 = vpack.c.bf16 %v1057_v2, %v1056_v1 }
 0x267   :  { %v877_v34 = vsel %vm420_vm6, %v853_v27, %v876_v28  ;;  %882 = vst.msk [vmem:[#allocation2 + $0x1] sm:$0xf] %vm881_vm13, %v875_v31  ;;  %v1956_v48 = vpack.c.bf16 %v1059_v47, %v1058_v4  ;;  %v1959_v5 = vpack.c.bf16 %v1061_v53, %v1060_v49  ;;  %v1962_v7 = vpack.c.bf16 %v1063_v6, %v1062_v54 }
 0x268   :  { %v860_v35 = vmax.f32 %v858_v23, %v859_v30  ;;  %v1965_v63 = vpack.c.bf16 %v1252_v45, %v1251_v8  ;;  %v1968_v58 = vpack.c.bf16 %v1254_v46, %v1253_v57  ;;  %v1971_v13 = vpack.c.bf16 %v1256_v11, %v1255_v42 }
 0x269   :  { %v1974_v15 = vpack.c.bf16 %v1258_v14, %v1257_v12  ;;  %v1166_v36 = vsub.s32 2, %v2190_v9 }
 0x26a   :  { %v878_v37 = vsel %vm422_vm7, %v860_v35, %v877_v34  ;;  %1966 = vmatpush3.bf16.msra.mxu1 %v1965_v63 }
 0x26b   :  { %883 = vst.msk [vmem:[#allocation2 + $0x11] sm:$0xf] %vm881_vm13, %v878_v37  ;;  %1967 = vmatprep.subr.bf16.mxu1 %v2059_v24 }
 0x26e   :  { %1969 = vmatpush3.bf16.msra.mxu1 %v1968_v58 }
 0x26f   :  { %1970 = vmatprep.subr.bf16.mxu1 %v2059_v24 }
 0x272   :  { %v2017_v41 = vld [vmem:[#allocation2 + $0x1] ss:$16 sps:$4 sm:$0xff]   ;;  %1972 = vmatpush3.bf16.msra.mxu1 %v1971_v13 }
 0x273   :  { %v2018_v43 = vld [vmem:[#allocation2] ss:$16 sps:$4 sm:$0xff]   ;;  %1783 = vmatmul.mubr.msk.f32.vlgmr.msra.gmra.mrb[6].mxu0 %vm136_vm3, %v2017_v41  ;;  %1973 = vmatprep.subr.bf16.mxu1 %v2059_v24 }
 0x274   :  { %v2019_v51 = vld [vmem:[#allocation2 + $0x2] ss:$16 sps:$4 sm:$0xff]   ;;  %1225 = vst.msk [vmem:[#allocation2] sm:$0x1] %vm397_vm2, %v2057_v29  ;;  %1226 = vst.msk [vmem:[#allocation2 + $0x10] sm:$0x1] %vm397_vm2, %v2057_v29  ;;  %1942 = vmatpush3.bf16.msra.mxu0 %v1941_v40  ;;  %1801 = vmatprep.mubr.msk.f32.mxu0 %vm2060_vm12, %v2057_v29 }
 0x275   :  { %1227 = vst.msk [vmem:[#allocation2 + $0x3] sm:$0x1] %vm397_vm2, %v2057_v29  ;;  %1228 = vst.msk [vmem:[#allocation2 + $0x13] sm:$0x1] %vm397_vm2, %v2057_v29  ;;  %1943 = vmatprep.subr.bf16.mxu0 %v2059_v24 }
 0x276   :  { %1975 = vmatpush3.bf16.msra.mxu1 %v1974_v15 }
 0x277   :  { %1976 = vmatprep.subr.bf16.mxu1 %v2059_v24 }
 0x278   :  { %1945 = vmatpush3.bf16.msra.mxu0 %v1944_v52 }
 0x279   :  { %1946 = vmatprep.subr.bf16.mxu0 %v2059_v24 }
 0x27c   :  { %1948 = vmatpush3.bf16.msra.mxu0 %v1947_v61 }
 0x27d   :  { %1949 = vmatprep.subr.bf16.mxu0 %v2059_v24 }
 0x280   :  { %1951 = vmatpush3.bf16.msra.mxu0 %v1950_v0 }
 0x281   :  { %1952 = vmatprep.subr.bf16.mxu0 %v2059_v24 }
 0x283   :  { %1802 = vmatmul.mubr.msk.f32.vlgmr.msra.gmra.mrb[6].mxu0 %vm136_vm3, %v2018_v43 }
 0x284   :  { %1954 = vmatpush3.bf16.msra.mxu0 %v1953_v3  ;;  %1820 = vmatprep.mubr.msk.f32.mxu0 %vm2060_vm12, %v2057_v29 }
 0x285   :  { %1955 = vmatprep.subr.bf16.mxu0 %v2059_v24 }
 0x288   :  { %1957 = vmatpush3.bf16.msra.mxu0 %v1956_v48 }
 0x289   :  { %1958 = vmatprep.subr.bf16.mxu0 %v2059_v24 }
 0x28c   :  { %1960 = vmatpush3.bf16.msra.mxu0 %v1959_v5 }
 0x28d   :  { %1961 = vmatprep.subr.bf16.mxu0 %v2059_v24 }
 0x290   :  { %1963 = vmatpush3.bf16.msra.mxu0 %v1962_v7 }
 0x293   :  { %1821 = vmatmul.mubr.msk.f32.vlgmr.msra.gmra.mrb[6].mxu0 %vm136_vm3, %v2019_v51 }
 0x366   :  { %v1135_v17 = vpop.f32.mrb[6].mxu0 }
 0x367   :  { %v1140_v44 = vsel %vm136_vm3, %v1135_v17, 0.0  ;;  %v1147_v56 = vmul.f32 %v1135_v17, %v1135_v17  ;;  %v1822_v18 = vpop.f32.mrb[7].mxu0 }
 0x368   :  { %v1141_v19 = vrot.slane %v1140_v44, 4 }
 0x369   :  { %v1148_v20 = vsel %vm136_vm3, %v1147_v56, 0.0 }
 0x36a   :  { %v1142_v21 = vadd.f32 %v1141_v19, %v1140_v44  ;;  %v1149_v32 = vrot.slane %v1148_v20, 4 }
 0x36c   :  { %v1143_v22 = vrot.slane %v1142_v21, 2  ;;  %v1150_v23 = vadd.f32 %v1149_v32, %v1148_v20  ;;  %v1241_v32 = vld [vmem:[%s2601_s4] sm:$0xff] }
 0x36e   :  { %v1144_v25 = vadd.f32 %v1143_v22, %v1142_v21  ;;  %v1151_v27 = vrot.slane %v1150_v23, 2  ;;  %v1242_v22 = vld [vmem:[%s2601_s4 + $0x8] sm:$0xff] }
 0x370   :  { %v1145_v55 = vrot.slane %v1144_v25, 1  ;;  %v1152_v28 = vadd.f32 %v1151_v27, %v1150_v23 }
 0x372   :  { %v1146_v30 = vadd.f32 %v1145_v55, %v1144_v25  ;;  %v1153_v31 = vrot.slane %v1152_v28, 1  ;;  %v1977_v25 = vpack.c.bf16 %v1242_v22, %v1241_v32  ;;  %v1243_v55 = vld [vmem:[%s2601_s4 + $0x10] sm:$0xff] }
 0x374   :  { %v1154_v34 = vadd.f32 %v1153_v31, %v1152_v28  ;;  %v1155_v35 = vmul.f32 0.125, %v1146_v30  ;;  %v1244_v28 = vld [vmem:[%s2601_s4 + $0x18] sm:$0xff]  ;;  %v1245_v31 = vld [vmem:[%s2601_s4 + $0x20] sm:$0xff] }
 0x375   :  { %v1980_v30 = vpack.c.bf16 %v1244_v28, %v1243_v55 }
 0x376   :  { %v1156_v37 = vmul.f32 0.125, %v1154_v34  ;;  %v1157_v38 = vmul.f32 %v1155_v35, %v1155_v35  ;;  %v1246_v34 = vld [vmem:[%s2601_s4 + $0x28] sm:$0xff] }
 0x378   :  { %v1158_v39 = vsub.f32 %v1156_v37, %v1157_v38  ;;  %v1247_v37 = vld [vmem:[%s2601_s4 + $0x30] sm:$0xff]  ;;  %v1248_v38 = vld [vmem:[%s2601_s4 + $0x38] sm:$0xff] }
 0x37a   :  { %v1159_v40 = vadd.f32 1e-05, %v1158_v39  ;;  %v1986_v39 = vpack.c.bf16 %v1248_v38, %v1247_v37 }
 0x37c   :  { %2027 = vrsqrt.f32 %v1159_v40 }
 0x386   :  { %v2028_v33 = vpop.eup %2027 }
 0x387   :  { %v1161_v41 = vmul.f32 %v2028_v33, %v2195_v10  ;;  %v1426_v33 = vld [vmem:[%s2601_s4 + $0x88] sm:$0xff] }
 0x389   :  { %v1162_v43 = vmul.f32 %v1161_v41, %v1155_v35  ;;  %v1167_v51 = vrot.slane %v1161_v41, %v1166_v36  ;;  %v1983_v35 = vpack.c.bf16 %v1246_v34, %v1245_v31 }
 0x38b   :  { %v1163_v52 = vsub.f32 %v2202_v16, %v1162_v43  ;;  %v1168_v59 = vmul.f32 %v1167_v51, %v1135_v17  ;;  %v1427_v51 = vld [vmem:[%s2601_s4 + $0x90] sm:$0xff] }
 0x38d   :  { %v1172_v60 = vrot.slane %v1163_v52, %v1166_v36  ;;  %v1425_v36 = vld [vmem:[%s2601_s4 + $0x80] sm:$0xff]  ;;  %v1428_v52 = vld [vmem:[%s2601_s4 + $0x98] sm:$0xff] }
 0x38e   :  { %v1989_v41 = vpack.c.bf16 %v1426_v33, %v1425_v36 }
 0x38f   :  { %v1173_v61 = vadd.f32 %v1172_v60, %v1168_v59  ;;  %v1992_v59 = vpack.c.bf16 %v1428_v52, %v1427_v51  ;;  %v1429_v60 = vld [vmem:[%s2601_s4 + $0xa0] sm:$0xff] }
 0x391   :  { %v1174_v62 = vmax.f32 %v1173_v61, 0.0  ;;  %v1430_v61 = vld [vmem:[%s2601_s4 + $0xa8] sm:$0xff] }
 0x393   :  { %v1176_v50 = vcombine.high %v1174_v62, %v1174_v62  ;;  %v1183_v0 = vrot.slane %v1174_v62, %v2206_v26  ;;  %v1995_v62 = vpack.c.bf16 %v1430_v61, %v1429_v60 }
 0x395   :  { %v1190_v1 = vrot.slane %v1176_v50, %v2206_v26  ;;  %v1191_v2 = vcombine.high %v1183_v0, %v1183_v0  ;;  %v1197_v3 = vsel %vm284_vm4, %v1183_v0, -inf  ;;  %v1431_v50 = vld [vmem:[%s2601_s4 + $0xb0] sm:$0xff] }
 0x396   :  { %v1198_v4 = vrot.slane %v1197_v3, 4 }
 0x397   :  { %v1192_v47 = vcombine.high %v1190_v1, %v1190_v1  ;;  %v1204_v10 = vsel %vm284_vm4, %v1191_v2, -inf  ;;  %v1211_v48 = vsel %vm284_vm4, %v1190_v1, -inf }
 0x398   :  { %v1199_v49 = vmax.f32 %v1197_v3, %v1198_v4  ;;  %v1205_v16 = vrot.slane %v1204_v10, 4  ;;  %v1212_v53 = vrot.slane %v1211_v48, 4 }
 0x399   :  { %v1218_v5 = vsel %vm284_vm4, %v1192_v47, -inf }
 0x39a   :  { %v1200_v54 = vrot.slane %v1199_v49, 2  ;;  %v1206_v6 = vmax.f32 %v1204_v10, %v1205_v16  ;;  %v1213_v7 = vmax.f32 %v1211_v48, %v1212_v53  ;;  %v1219_v8 = vrot.slane %v1218_v5, 4 }
 0x39c   :  { %v1201_v45 = vmax.f32 %v1199_v49, %v1200_v54  ;;  %v1207_v63 = vrot.slane %v1206_v6, 2  ;;  %v1214_v57 = vrot.slane %v1213_v7, 2  ;;  %v1220_v46 = vmax.f32 %v1218_v5, %v1219_v8 }
 0x39e   :  { %v1202_v58 = vrot.slane %v1201_v45, 1  ;;  %v1208_v42 = vmax.f32 %v1206_v6, %v1207_v63  ;;  %v1215_v11 = vmax.f32 %v1213_v7, %v1214_v57  ;;  %v1221_v12 = vrot.slane %v1220_v46, 2 }
 0x3a0   :  { %v1209_v13 = vrot.slane %v1208_v42, 1  ;;  %v1216_v14 = vrot.slane %v1215_v11, 1  ;;  %v1222_v15 = vmax.f32 %v1220_v46, %v1221_v12  ;;  %v1203_v17 = vmax.f32 %v1201_v45, %v1202_v58 }
 0x3a2   :  { %v1210_v44 = vmax.f32 %v1208_v42, %v1209_v13  ;;  %v1223_v56 = vrot.slane %v1222_v15, 1  ;;  %v1217_v18 = vmax.f32 %v1215_v11, %v1216_v14  ;;  %v1542_v13 = vsub.s32 3, %v2190_v9 }
 0x3a4   :  { %v1224_v19 = vmax.f32 %v1222_v15, %v1223_v56  ;;  %v1233_v20 = vsel %vm418_vm5, %v1210_v44, %v1203_v17  ;;  %v2031_v15 = vld [vmem:[%s2602_s5] sm:$0xf]  ;;  %s2061_s5 = smov [#allocation3]  }
 0x3a5   :  { %1237 = vst.msk [vmem:[#allocation2 + $0x1] sm:$0x3] %vm284_vm4, %v1233_v20 }
 0x3a6   :  { %v1234_v21 = vsel %vm418_vm5, %v1224_v19, %v1217_v18  ;;  %v2032_v18 = vld [vmem:[%s2603_s6] sm:$0xf]  ;;  %s1587_s6 = sshll.u32 %s2061_s5, 4  ;;  %s1588_s6 = int_to_ptr.vmem [resolvable:$true] %s1587_s6 }
 0x3a7   :  { %1238 = vst.msk [vmem:[#allocation2 + $0x11] sm:$0x3] %vm284_vm4, %v1234_v21  ;;  %s2033_s29 = scalar_lea.vmem %s1588_s6, 32  ;;  %p2038_p1 = scmp.lt.s32.totalorder %s1588_s6, %s1588_s6 }
 0x3a8   :  { %p2034_p0 = scmp.ne.s32.totalorder %s1588_s6, %s2033_s29  ;;  %p2039_p2 = scmp.lt.s32.totalorder %s2033_s29, %s2033_s29 }
 0x3aa   :  { %p2040_p3 = por %p2039_p2, %p2038_p1 }
 0x3ac   :  { %p2041_p4 = pnand %p2040_p3, %p2034_p0 }
 0x3ae   :  { %v2020_v23 = vld [vmem:[#allocation2 + $0x1] ss:$16 sps:$4 sm:$0x33]  }
 0x3af   :  { %v1268_v27 = vrot.slane %v2020_v23, %v2206_v26  ;;  %v2021_v40 = vld [vmem:[#allocation2] ss:$16 sps:$4 sm:$0x33]   ;;  %v2022_v1 = vld [vmem:[#allocation2 + $0x2] ss:$16 sps:$4 sm:$0x33]  }
 0x3b0   :  { %v1350_v43 = vrot.slane %v2021_v40, %v2206_v26  ;;  %v1442_v2 = vrot.slane %v2022_v1, %v2206_v26 }
 0x3b1   :  { %1840 = vmatmul.mubr.msk.f32.vlgmr.msra.gmra.mrb[2].mxu1 %vm136_vm3, %v1268_v27 }
 0x3b2   :  { %1978 = vmatpush3.bf16.msra.mxu1 %v1977_v25  ;;  %1858 = vmatprep.mubr.msk.f32.mxu1 %vm2060_vm12, %v2057_v29 }
 0x3b3   :  { %1979 = vmatprep.subr.bf16.mxu1 %v2059_v24 }
 0x3b6   :  { %1981 = vmatpush3.bf16.msra.mxu1 %v1980_v30 }
 0x3b7   :  { %1982 = vmatprep.subr.bf16.mxu1 %v2059_v24 }
 0x3ba   :  { %1984 = vmatpush3.bf16.msra.mxu1 %v1983_v35 }
 0x3bb   :  { %1985 = vmatprep.subr.bf16.mxu1 %v2059_v24 }
 0x3be   :  { %1987 = vmatpush3.bf16.msra.mxu1 %v1986_v39 }
 0x3bf   :  { %1988 = vmatprep.subr.bf16.mxu1 %v2059_v24 }
 0x3c1   :  { %1859 = vmatmul.mubr.msk.f32.vlgmr.msra.gmra.mrb[2].mxu1 %vm136_vm3, %v1350_v43 }
 0x3c2   :  { %1990 = vmatpush3.bf16.msra.mxu1 %v1989_v41  ;;  %1877 = vmatprep.mubr.msk.f32.mxu1 %vm2060_vm12, %v2057_v29  ;;  %v1432_v29 = vld [vmem:[%s2601_s4 + $0xb8] sm:$0xff] }
 0x3c3   :  { %1991 = vmatprep.subr.bf16.mxu1 %v2059_v24  ;;  %v1998_v0 = vpack.c.bf16 %v1432_v29, %v1431_v50 }
 0x3c6   :  { %1993 = vmatpush3.bf16.msra.mxu1 %v1992_v59 }
 0x3c7   :  { %1994 = vmatprep.subr.bf16.mxu1 %v2059_v24 }
 0x3ca   :  { %1996 = vmatpush3.bf16.msra.mxu1 %v1995_v62 }
 0x3cb   :  { %1997 = vmatprep.subr.bf16.mxu1 %v2059_v24 }
 0x3ce   :  { %1999 = vmatpush3.bf16.msra.mxu1 %v1998_v0 }
 0x3d1   :  { %1878 = vmatmul.mubr.msk.f32.vlgmr.msra.gmra.mrb[2].mxu1 %vm136_vm3, %v1442_v2 }
 0x4a4   :  { %v1511_v3 = vpop.f32.mrb[2].mxu1 }
 0x4a5   :  { %v1516_v4 = vsel %vm881_vm13, %v1511_v3, 0.0  ;;  %v1523_v47 = vmul.f32 %v1511_v3, %v1511_v3  ;;  %v1879_v10 = vpop.f32.mrb[3].mxu1 }
 0x4a6   :  { %v1517_v48 = vrot.slane %v1516_v4, 4 }
 0x4a7   :  { %v1524_v49 = vsel %vm881_vm13, %v1523_v47, 0.0 }
 0x4a8   :  { %v1518_v16 = vadd.f32 %v1517_v48, %v1516_v4  ;;  %v1525_v53 = vrot.slane %v1524_v49, 4 }
 0x4aa   :  { %v1519_v5 = vrot.slane %v1518_v16, 2  ;;  %v1526_v54 = vadd.f32 %v1525_v53, %v1524_v49 }
 0x4ac   :  { %v1520_v6 = vadd.f32 %v1519_v5, %v1518_v16  ;;  %v1527_v24 = vrot.slane %v1526_v54, 2 }
 0x4ae   :  { %v1521_v7 = vrot.slane %v1520_v6, 1  ;;  %v1528_v8 = vadd.f32 %v1527_v24, %v1526_v54 }
 0x4b0   :  { %v1522_v45 = vadd.f32 %v1521_v7, %v1520_v6  ;;  %v1529_v63 = vrot.slane %v1528_v8, 1 }
 0x4b2   :  { %v1530_v57 = vadd.f32 %v1529_v63, %v1528_v8  ;;  %v1531_v46 = vmul.f32 0.25, %v1522_v45 }
 0x4b4   :  { %v1532_v58 = vmul.f32 0.25, %v1530_v57  ;;  %v1533_v42 = vmul.f32 %v1531_v46, %v1531_v46 }
 0x4b6   :  { %v1534_v11 = vsub.f32 %v1532_v58, %v1533_v42 }
 0x4b8   :  { %v1535_v12 = vadd.f32 1e-05, %v1534_v11 }
 0x4ba   :  { %2029 = vrsqrt.f32 %v1535_v12 }
 0x4c4   :  { %v2030_v14 = vpop.eup %2029 }
 0x4c5   :  { %v1537_v17 = vmul.f32 %v2031_v15, %v2030_v14 }
 0x4c7   :  { %v1538_v44 = vmul.f32 %v1537_v17, %v1531_v46  ;;  %v1543_v56 = vrot.slane %v1537_v17, %v1542_v13 }
 0x4c9   :  { %v1539_v19 = vsub.f32 %v2032_v18, %v1538_v44  ;;  %v1544_v20 = vmul.f32 %v1543_v56, %v1511_v3 }
 0x4cb   :  { %v1548_v21 = vrot.slane %v1539_v19, %v1542_v13 }
 0x4cd   :  { %v1549_v32 = vadd.f32 %v1548_v21, %v1544_v20 }
 0x4cf   :  { %v1550_v22 = vmax.f32 %v1549_v32, 0.0 }
 0x4d1   :  { %v1558_v23 = vrot.slane %v1550_v22, %v2206_v26 }
 0x4d3   :  { %v1559_v9 = vcombine.high %v1558_v23, %v1558_v23  ;;  %v1562_v25 = vsel %vm284_vm4, %v1558_v23, -inf }
 0x4d4   :  { %v1563_v27 = vrot.slane %v1562_v25, 4 }
 0x4d5   :  { %v1569_v55 = vsel %vm284_vm4, %v1559_v9, -inf }
 0x4d6   :  { %v1564_v28 = vmax.f32 %v1562_v25, %v1563_v27  ;;  %v1570_v30 = vrot.slane %v1569_v55, 4 }
 0x4d8   :  { %v1565_v31 = vrot.slane %v1564_v28, 2  ;;  %v1571_v34 = vmax.f32 %v1569_v55, %v1570_v30 }
 0x4da   :  { %v1566_v35 = vmax.f32 %v1564_v28, %v1565_v31  ;;  %v1572_v37 = vrot.slane %v1571_v34, 2 }
 0x4dc   :  { %v1567_v38 = vrot.slane %v1566_v35, 1  ;;  %v1573_v39 = vmax.f32 %v1571_v34, %v1572_v37 }
 0x4de   :  { %v1574_v40 = vrot.slane %v1573_v39, 1  ;;  %v1568_v36 = vmax.f32 %v1566_v35, %v1567_v38 }
 0x4e0   :  { %v1575_v33 = vmax.f32 %v1573_v39, %v1574_v40 }
 0x4e2   :  { %v1578_v26 = vsel %vm418_vm5, %v1575_v33, %v1568_v36 }
 0x4e3   :  { %1580 = vst.msk [vmem:[#allocation3] sm:$0x3] %vm284_vm4, %v1578_v26 }
 0x4e4   :  { %2044 = shalt.err (!%p2041_p4)
}
 0x4e5   :  { %s2045_s1 = scalar_lea.hbm %s2604_s7, 32 }
 0x4e6   :  { %p2046_p5 = scmp.ne.s32.totalorder %s2604_s7, %s2045_s1  ;;  %p2049_p6 = scmp.lt.u32.totalorder %s2045_s1, %s2604_s7 }
 0x4e8   :  { %p2051_p7 = pnand %p2049_p6, %p2046_p5 }
 0x4ea   :  { %2054 = shalt.err (!%p2051_p7)
}
 0x4eb   :  { %1590 = dma.vmem_to_hbm [thread:$0]  %s1588_s6, 32, %s2604_s7, [#allocation4]  }
 0x4ec   :  { %2055 = dma.done.wait [#allocation4], 32  }
 0x4ed   :  { %2056 = vsyncadd [#allocation4], 4294967264 }
 0x4ee   :  { %1594 = vsyncpa [#allocation4], 1 }

</bundles_post_ra>
